<compile_context>
chip_gen: v5e
topology: v5e:2x2
jax: 0.10.0
libtpu: 0.0.40
codegen_flags: <defaults>
</compile_context>

<pallas_src>
import math
from functools import partial

import numpy as np
import jax
import jax.numpy as jnp
from jax.experimental import pallas as pl
from jax.experimental.pallas import tpu as pltpu


# dtype used for MXU operands (accumulation is always f32 via preferred_element_type).
MATMUL_DTYPE = jnp.bfloat16


# ----------------------------- in-kernel helpers -----------------------------

def _layernorm(x, g, b, eps=1e-5):
    # var = E[x^2] - mu^2: two independent lane reductions (can pipeline on the XLU).
    mu = jnp.mean(x, axis=-1, keepdims=True)
    ms = jnp.mean(x * x, axis=-1, keepdims=True)
    return (x - mu) * jax.lax.rsqrt(ms - mu * mu + eps) * g + b


# --------------------- fused transformer encoder stack -----------------------
# grid = (batch_blocks, num_layers); the layer axis is last ("arbitrary") so for a
# fixed batch block the layers run back-to-back with the activation resident in the
# output VMEM block (initialized from x at l == 0, written back to HBM after l == L-1).
# Post-norm (PyTorch norm_first=False), ReLU activation, additive key-padding bias.

def encoder_stack_kernel(x_ref, bias_ref, wqkv_ref, wo_ref, w1_ref, w2_ref,
                         bqkv_ref, b1_ref, vec_ref, o_ref, *, num_heads):
    l = pl.program_id(1)

    @pl.when(l == 0)
    def _():
        o_ref[...] = x_ref[...]          # load activation into the resident block

    BB, S, E = o_ref.shape
    H = num_heads
    Dh = E // H
    scale = 1.0 / math.sqrt(Dh)
    dt = wqkv_ref.dtype                  # matmul operand dtype (bf16)

    x3 = o_ref[...]                      # (BB, S, E) f32 carried activation
    bias = bias_ref[...]                 # (BB, 1, S) additive mask (0 / -1e9)
    vecs = vec_ref[...]                  # (6, E): [bo, ln1_g, ln1_b, ln2_g, ln2_b, b2]

    # Fold batch into MXU rows for all row-parallel matmuls.
    x2 = x3.reshape(BB * S, E)

    # Fused QKV projection: single lane-dense (E, 3E) matmul, f32 accumulate,
    # cast to bf16 once (halves stored bytes of the qkv intermediate).
    qkv = (jnp.dot(x2.astype(dt), wqkv_ref[...], preferred_element_type=jnp.float32)
           + bqkv_ref[...]).astype(dt)                                     # (BB*S, 3E)
    q3 = qkv[:, :E].reshape(BB, S, E)
    k3 = qkv[:, E:2 * E].reshape(BB, S, E)
    v3 = qkv[:, 2 * E:].reshape(BB, S, E)

    # Per-head scores / PV as batch-blocked 3-D einsums; heads merged back so the
    # output projection is ONE K=E matmul against Wo (no per-head K=Dh matmuls).
    heads = []
    for h in range(H):
        sl = slice(h * Dh, (h + 1) * Dh)
        s = jnp.einsum('bqd,bkd->bqk', q3[:, :, sl], k3[:, :, sl],
                       preferred_element_type=jnp.float32) * scale + bias  # (BB,S,S)
        s = s - jnp.max(s, axis=-1, keepdims=True)
        p = jnp.exp(s)
        p = p * pl.reciprocal(jnp.sum(p, axis=-1, keepdims=True), approx=True)
        heads.append(jnp.einsum('bqk,bkd->bqd', p.astype(dt), v3[:, :, sl],
                                preferred_element_type=jnp.float32).astype(dt))
    ctx = jnp.concatenate(heads, axis=-1).reshape(BB * S, E)               # (BB*S, E) bf16
    attn = jnp.dot(ctx, wo_ref[...], preferred_element_type=jnp.float32) + vecs[0:1]

    y = _layernorm(x2 + attn, vecs[1:2], vecs[2:3])                        # f32
    h1 = jnp.maximum(
        jnp.dot(y.astype(dt), w1_ref[...], preferred_element_type=jnp.float32)
        + b1_ref[...], 0.0).astype(dt)                                     # bf16 hidden
    h2 = jnp.dot(h1, w2_ref[...], preferred_element_type=jnp.float32) + vecs[5:6]
    out = _layernorm(y + h2, vecs[3:4], vecs[4:5])
    o_ref[...] = out.reshape(BB, S, E)


def encoder_stack(x, mask_bias, sp, *, num_heads, batch_block=None):
    B, S, E = x.shape
    L = sp['wqkv'].shape[0]
    FF = sp['w1'].shape[-1]
    H = num_heads
    # TODO(synk): on v7x (2 TensorCores) pick batch_block = B//2 so the "parallel"
    # batch axis actually has >= 2 steps; B is per-chip batch, keep BB=B on v5e/v6e.
    BB = B if batch_block is None else batch_block
    assert B % BB == 0

    stacked = [sp['wqkv'], sp['wo'], sp['w1'], sp['w2'],
               sp['bqkv'], sp['b1'], sp['vec']]

    def lspec(a):
        # layer-stacked params: leading L dim squeezed, indexed by the layer grid axis
        # (index changes every step -> default double-buffering prefetches layer l+1).
        n = a.ndim - 1
        return pl.BlockSpec((None,) + a.shape[1:],
                            lambda b, l, _n=n: (l,) + (0,) * _n)

    in_specs = [pl.BlockSpec((BB, S, E), lambda b, l: (b, 0, 0)),
                pl.BlockSpec((BB, 1, S), lambda b, l: (b, 0, 0))]
    in_specs += [lspec(a) for a in stacked]

    flops = int(L * (2 * B * S * (3 * E * E + E * E + 2 * E * FF)
                     + 4 * B * S * S * E))
    transcendentals = int(L * B * H * S * S)
    bytes_accessed = int(sum(int(a.size) * a.dtype.itemsize
                             for a in [x, mask_bias] + stacked) + x.size * 4)

    return pl.pallas_call(
        partial(encoder_stack_kernel, num_heads=num_heads),
        out_shape=jax.ShapeDtypeStruct((B, S, E), jnp.float32),
        grid=(B // BB, L),
        in_specs=in_specs,
        out_specs=pl.BlockSpec((BB, S, E), lambda b, l: (b, 0, 0)),
        compiler_params=pltpu.CompilerParams(
            # batch blocks independent (shardable across v7x's 2 TCs); layer axis is
            # a sequential carry over the resident output block.
            dimension_semantics=("parallel", "arbitrary"),
            # fits v5e/v6e (128 MiB) and v7x (64 MiB) physical VMEM with headroom.
            vmem_limit_bytes=48 * 1024 * 1024),
        cost_estimate=pl.CostEstimate(flops=flops,
                                      transcendentals=transcendentals,
                                      bytes_accessed=bytes_accessed),
    )(x, mask_bias, *stacked)


# ------------------- fused mean-pool + norms + both TaskHeads -------------------
# TaskHead attention is single-head self-attention on a length-1 sequence: softmax
# over one key is identically 1, so attended = out_proj(v_proj(x)) -- pre-folded in
# glue into one affine map (watt, batt). Both heads run t-batched in one pallas_call;
# the class dim is padded to 128 (lane-dense output) and sliced off in glue.

def pool_heads_kernel(x_ref, m_ref, watt_ref, w1_ref, w2_ref,
                      ln_ref, batt_ref, b1_ref, b2_ref,
                      pooled_ref, logits_ref):
    x = x_ref[...]                                     # (B, S, E) f32
    m = m_ref[...]                                     # (B, S) f32
    num = jnp.sum(x * m[:, :, None], axis=1)           # (B, E)
    den = jnp.maximum(jnp.sum(m, axis=1, keepdims=True), 1e-9)
    pooled = num / den
    pooled_ref[...] = pooled

    # LayerNorm statistics are shared by topic_norm / sentiment_norm; only the
    # per-task affine differs, applied broadcast over the task axis.
    mu = jnp.mean(pooled, axis=-1, keepdims=True)
    ms = jnp.mean(pooled * pooled, axis=-1, keepdims=True)
    xhat = (pooled - mu) * jax.lax.rsqrt(ms - mu * mu + 1e-5)          # (B, E)
    ln = ln_ref[...]                                   # (2, 2, E): [g, b] per task
    feats = xhat[None, :, :] * ln[:, 0:1, :] + ln[:, 1:2, :]           # (2, B, E)

    dt = watt_ref.dtype
    att = jnp.einsum('tbe,tef->tbf', feats.astype(dt), watt_ref[...],
                     preferred_element_type=jnp.float32) + batt_ref[...]   # (2,B,E)
    hh = jnp.maximum(
        jnp.einsum('tbe,teh->tbh', att.astype(dt), w1_ref[...],
                   preferred_element_type=jnp.float32) + b1_ref[...], 0.0)  # (2,B,HH)
    logits_ref[...] = jnp.einsum('tbh,thc->tbc', hh.astype(dt), w2_ref[...],
                                 preferred_element_type=jnp.float32) + b2_ref[...]


def pool_and_heads(x, maskf, hp):
    B, S, E = x.shape
    HH = hp['w1'].shape[-1]
    CP = hp['w2'].shape[-1]                            # padded class dim (128)
    arrs = [x, maskf, hp['watt'], hp['w1'], hp['w2'],
            hp['ln'], hp['batt'], hp['b1'], hp['b2']]
    flops = int(2 * 2 * B * (E * E + E * HH + HH * CP) + 2 * B * S * E)
    bytes_accessed = int(sum(int(a.size) * a.dtype.itemsize for a in arrs)
                         + B * E * 4 + 2 * B * CP * 4)
    return pl.pallas_call(
        pool_heads_kernel,
        out_shape=(jax.ShapeDtypeStruct((B, E), jnp.float32),
                   jax.ShapeDtypeStruct((2, B, CP), jnp.float32)),
        compiler_params=pltpu.CompilerParams(vmem_limit_bytes=32 * 1024 * 1024),
        cost_estimate=pl.CostEstimate(flops=flops, transcendentals=0,
                                      bytes_accessed=bytes_accessed),
    )(*arrs)


# ------------------------------ parameter setup ------------------------------

def _sinusoidal_pe(max_len, dim):
    pos = np.arange(max_len, dtype=np.float32)[:, None]
    div = np.exp(np.arange(0, dim, 2, dtype=np.float32) * (-math.log(10000.0) / dim))
    pe = np.zeros((max_len, dim), dtype=np.float32)
    pe[:, 0::2] = np.sin(pos * div)
    pe[:, 1::2] = np.cos(pos * div)
    return jnp.asarray(pe)


def init_params(key, *, vocab, E, num_heads, ff, num_layers, head_hidden,
                n_topic, n_sent, max_len, matmul_dtype=MATMUL_DTYPE):
    assert E % num_heads == 0
    assert E % 128 == 0, "lane-dense layout expects E to be a multiple of 128"
    CP = 128                                           # padded class dim
    assert n_topic <= CP and n_sent <= CP
    keys = iter(jax.random.split(key, 4 * num_layers + 16))

    def wf(shape, scale=0.02):                         # f32, pre-transposed (in, out)
        return jax.random.normal(next(keys), shape, jnp.float32) * scale

    zeros = lambda s: jnp.zeros(s, jnp.float32)
    ones = lambda s: jnp.ones(s, jnp.float32)

    params = {
        'embedding': wf((vocab, E)),
        'pe': _sinusoidal_pe(max_len, E),
        'n_topic': n_topic, 'n_sent': n_sent,
    }

    # ----- encoder stack: per-layer weights stacked along a leading L axis -----
    wqkv_l, wo_l, w1_l, w2_l = [], [], [], []
    for _ in range(num_layers):
        wqkv_l.append(wf((E, 3 * E)))                  # fused Q/K/V, (in, out)
        wo_l.append(wf((E, E)))
        w1_l.append(wf((E, ff)))
        w2_l.append(wf((ff, E)))
    # packed small per-layer params: [bo, ln1_g, ln1_b, ln2_g, ln2_b, b2]
    vec_one = jnp.concatenate([zeros((1, E)), ones((1, E)), zeros((1, E)),
                               ones((1, E)), zeros((1, E)), zeros((1, E))], axis=0)
    params['stack'] = dict(
        wqkv=jnp.stack(wqkv_l).astype(matmul_dtype),   # (L, E, 3E)
        wo=jnp.stack(wo_l).astype(matmul_dtype),       # (L, E, E)
        w1=jnp.stack(w1_l).astype(matmul_dtype),       # (L, E, FF)
        w2=jnp.stack(w2_l).astype(matmul_dtype),       # (L, FF, E)
        bqkv=jnp.zeros((num_layers, 1, 3 * E), jnp.float32),
        b1=jnp.zeros((num_layers, 1, ff), jnp.float32),
        vec=jnp.tile(vec_one[None], (num_layers, 1, 1)),   # (L, 6, E)
    )

    # ----- task heads: fold length-1-seq attention into one affine map -----
    def padded_w2(n_classes):
        w_small = wf((head_hidden, n_classes))
        return jnp.zeros((head_hidden, CP), jnp.float32).at[:, :n_classes].set(w_small)

    watt_l, batt_l, w1h_l, w2h_l = [], [], [], []
    for n_cls in (n_topic, n_sent):
        wv_io, wo_io = wf((E, E)), wf((E, E))          # v_proj / out_proj (in, out)
        bv, bo = zeros((1, E)), zeros((1, E))
        watt_l.append(wv_io @ wo_io)                   # softmax over one key == 1
        batt_l.append(bv @ wo_io + bo)
        w1h_l.append(wf((E, head_hidden)))
        w2h_l.append(padded_w2(n_cls))
    ln_one = jnp.stack([jnp.ones((E,), jnp.float32), jnp.zeros((E,), jnp.float32)])
    params['heads'] = dict(
        watt=jnp.stack(watt_l).astype(matmul_dtype),   # (2, E, E)
        w1=jnp.stack(w1h_l).astype(matmul_dtype),      # (2, E, HH)
        w2=jnp.stack(w2h_l).astype(matmul_dtype),      # (2, HH, 128)
        ln=jnp.stack([ln_one, ln_one]),                # (2, 2, E)
        batt=jnp.stack(batt_l),                        # (2, 1, E)
        b1=jnp.zeros((2, 1, head_hidden), jnp.float32),
        b2=jnp.zeros((2, 1, CP), jnp.float32),
    )
    return params


# ---------------------------------- forward ----------------------------------

def forward(params, input_ids, attention_mask, *, num_heads):
    # TODO(synk): embedding gather (nn.Embedding) stays as jnp.take in glue;
    # a Pallas DMA-gather is overkill at these sizes.
    x = jnp.take(params['embedding'], input_ids, axis=0)              # (B, S, E)
    S = x.shape[1]
    x = x + params['pe'][:S][None]                                    # pos-enc (dropout = identity, eval)

    maskf = attention_mask.astype(jnp.float32)                        # (B, S)
    mask_bias = jnp.where(maskf > 0, 0.0, -1e9).astype(jnp.float32)[:, None, :]  # (B,1,S)

    x = encoder_stack(x, mask_bias, params['stack'], num_heads=num_heads)

    pooled, logits = pool_and_heads(x, maskf, params['heads'])        # (B,E), (2,B,128)
    return {'topic': logits[0, :, :params['n_topic']],
            'sentiment': logits[1, :, :params['n_sent']],
            'shared_embedding': pooled}


# ------------------------------------ main ------------------------------------

if __name__ == "__main__":
    # Small shapes consistent with the module (scaled-down hyperparameters),
    # chosen lane-dense: E multiple of 128.
    B, S = 2, 8
    E, H, FF, L = 128, 4, 256, 2
    VOCAB = 30522
    HEAD_HIDDEN = 256
    N_TOPIC, N_SENT = 5, 3

    root = jax.random.PRNGKey(0)
    pkey, ikey = jax.random.split(root)

    params = init_params(pkey, vocab=VOCAB, E=E, num_heads=H, ff=FF,
                         num_layers=L, head_hidden=HEAD_HIDDEN,
                         n_topic=N_TOPIC, n_sent=N_SENT, max_len=64)

    input_ids = jax.random.randint(ikey, (B, S), 0, VOCAB, dtype=jnp.int32)
    attention_mask = jnp.array([[1] * S, [1] * (S - 2) + [0] * 2], dtype=jnp.int32)

    out = forward(params, input_ids, attention_mask, num_heads=H)
    out = jax.block_until_ready(out)

    assert out['topic'].shape == (B, N_TOPIC)
    assert out['sentiment'].shape == (B, N_SENT)
    assert out['shared_embedding'].shape == (B, E)
    assert all(bool(jnp.all(jnp.isfinite(v))) for v in out.values())

    print("KERNEL_OK")
</pallas_src>

<mosaic_0001>
module attributes {stable_mosaic.version = 11 : i64} {
  func.func @encoder_stack_kernel(%arg0: i32, %arg1: i32, %arg2: memref<2x8x128xf32, #tpu.memory_space<vmem>>, %arg3: memref<2x1x8xf32, #tpu.memory_space<vmem>>, %arg4: memref<1x128x384xbf16, #tpu.memory_space<vmem>>, %arg5: memref<1x128x128xbf16, #tpu.memory_space<vmem>>, %arg6: memref<1x128x256xbf16, #tpu.memory_space<vmem>>, %arg7: memref<1x256x128xbf16, #tpu.memory_space<vmem>>, %arg8: memref<1x1x384xf32, #tpu.memory_space<vmem>>, %arg9: memref<1x1x256xf32, #tpu.memory_space<vmem>>, %arg10: memref<1x6x128xf32, #tpu.memory_space<vmem>>, %arg11: memref<2x8x128xf32, #tpu.memory_space<vmem>>) attributes {dimension_semantics = [#tpu.dimension_semantics<parallel>, #tpu.dimension_semantics<arbitrary>], iteration_bounds = array<i64: 1, 2>, scalar_prefetch = 0 : i64, scratch_operands = 0 : i64, tpu.core_type = #tpu.core_type<tc>, window_params = [{transform_indices = @transform_0, window_bounds = array<i64: 2, 8, 128>}, {transform_indices = @transform_1, window_bounds = array<i64: 2, 1, 8>}, {transform_indices = @transform_2, window_bounds = array<i64: 1, 128, 384>}, {transform_indices = @transform_3, window_bounds = array<i64: 1, 128, 128>}, {transform_indices = @transform_4, window_bounds = array<i64: 1, 128, 256>}, {transform_indices = @transform_5, window_bounds = array<i64: 1, 256, 128>}, {transform_indices = @transform_6, window_bounds = array<i64: 1, 1, 384>}, {transform_indices = @transform_7, window_bounds = array<i64: 1, 1, 256>}, {transform_indices = @transform_8, window_bounds = array<i64: 1, 6, 128>}, {transform_indices = @transform_9, window_bounds = array<i64: 2, 8, 128>}]} {
    %c0_i32 = arith.constant 0 : i32
    %0 = arith.cmpi eq, %arg1, %c0_i32 : i32
    %1 = arith.extui %0 : i1 to i32
    %c0_i32_0 = arith.constant 0 : i32
    %2 = arith.cmpi ne, %1, %c0_i32_0 : i32
    scf.if %2 {
      %c0_64 = arith.constant 0 : index
      %c0_65 = arith.constant 0 : index
      %c0_66 = arith.constant 0 : index
      %184 = vector.load %arg2[%c0_64, %c0_65, %c0_66] : memref<2x8x128xf32, #tpu.memory_space<vmem>>, vector<2x8x128xf32>
      %c0_67 = arith.constant 0 : index
      %c0_68 = arith.constant 0 : index
      %c0_69 = arith.constant 0 : index
      %185 = vector.load %arg11[%c0_67, %c0_68, %c0_69] : memref<2x8x128xf32, #tpu.memory_space<vmem>>, vector<2x8x128xf32>
      tpu.vector_store %arg11[%c0_67, %c0_68, %c0_69], %184 {strides = array<i32>} : memref<2x8x128xf32, #tpu.memory_space<vmem>>, vector<2x8x128xf32>,
    } else {
    }
    %c0 = arith.constant 0 : index
    %c0_1 = arith.constant 0 : index
    %c0_2 = arith.constant 0 : index
    %3 = vector.load %arg11[%c0, %c0_1, %c0_2] : memref<2x8x128xf32, #tpu.memory_space<vmem>>, vector<2x8x128xf32>
    %c0_3 = arith.constant 0 : index
    %c0_4 = arith.constant 0 : index
    %c0_5 = arith.constant 0 : index
    %4 = vector.load %arg3[%c0_3, %c0_4, %c0_5] : memref<2x1x8xf32, #tpu.memory_space<vmem>>, vector<2x1x8xf32>
    %c0_6 = arith.constant 0 : index
    %c0_7 = arith.constant 0 : index
    %c0_8 = arith.constant 0 : index
    %5 = vector.load %arg10[%c0_6, %c0_7, %c0_8] : memref<1x6x128xf32, #tpu.memory_space<vmem>>, vector<1x6x128xf32>
    %6 = vector.shape_cast %5 : vector<1x6x128xf32> to vector<6x128xf32>
    %7 = vector.shape_cast %3 : vector<2x8x128xf32> to vector<16x128xf32>
    %8 = arith.truncf %7 : vector<16x128xf32> to vector<16x128xbf16>
    %c0_9 = arith.constant 0 : index
    %c0_10 = arith.constant 0 : index
    %c0_11 = arith.constant 0 : index
    %9 = vector.load %arg4[%c0_9, %c0_10, %c0_11] : memref<1x128x384xbf16, #tpu.memory_space<vmem>>, vector<1x128x384xbf16>
    %10 = vector.shape_cast %9 : vector<1x128x384xbf16> to vector<128x384xbf16>
    %cst = arith.constant dense<0.000000e+00> : vector<16x384xf32>
    %11 = tpu.matmul %8, %10, %cst {dimension_numbers = #tpu.dot_dimension_numbers<[1], [0], [0], [1], [0, 0, 1, 1], [], []>} : vector<16x128xbf16>, vector<128x384xbf16>, vector<16x384xf32> -> vector<16x384xf32>
    %c0_12 = arith.constant 0 : index
    %c0_13 = arith.constant 0 : index
    %c0_14 = arith.constant 0 : index
    %12 = vector.load %arg8[%c0_12, %c0_13, %c0_14] : memref<1x1x384xf32, #tpu.memory_space<vmem>>, vector<1x1x384xf32>
    %13 = vector.shape_cast %12 : vector<1x1x384xf32> to vector<1x384xf32>
    %14 = vector.broadcast %13 : vector<1x384xf32> to vector<16x384xf32>
    %15 = arith.addf %11, %14 : vector<16x384xf32>
    %16 = arith.truncf %15 : vector<16x384xf32> to vector<16x384xbf16>
    %17 = vector.extract_strided_slice %16 {offsets = [0, 0], sizes = [16, 128], strides = [1, 1]} : vector<16x384xbf16> to vector<16x128xbf16>
    %18 = vector.shape_cast %17 : vector<16x128xbf16> to vector<2x8x128xbf16>
    %19 = vector.extract_strided_slice %16 {offsets = [0, 128], sizes = [16, 128], strides = [1, 1]} : vector<16x384xbf16> to vector<16x128xbf16>
    %20 = vector.shape_cast %19 : vector<16x128xbf16> to vector<2x8x128xbf16>
    %21 = vector.extract_strided_slice %16 {offsets = [0, 256], sizes = [16, 128], strides = [1, 1]} : vector<16x384xbf16> to vector<16x128xbf16>
    %22 = vector.shape_cast %21 : vector<16x128xbf16> to vector<2x8x128xbf16>
    %23 = vector.extract_strided_slice %18 {offsets = [0, 0, 0], sizes = [2, 8, 32], strides = [1, 1, 1]} : vector<2x8x128xbf16> to vector<2x8x32xbf16>
    %24 = vector.extract_strided_slice %20 {offsets = [0, 0, 0], sizes = [2, 8, 32], strides = [1, 1, 1]} : vector<2x8x128xbf16> to vector<2x8x32xbf16>
    "tpu.trace_start"() <{level = 10 : i32, message = "bqd,bkd->bqk"}> : () -> ()
    %cst_15 = arith.constant dense<0.000000e+00> : vector<2x8x8xf32>
    %25 = tpu.matmul %23, %24, %cst_15 {dimension_numbers = #tpu.dot_dimension_numbers<[2], [2], [1], [1], [0, 0, 0, 1, 1, 1], [0], [0]>} : vector<2x8x32xbf16>, vector<2x8x32xbf16>, vector<2x8x8xf32> -> vector<2x8x8xf32>
    "tpu.trace_stop"() : () -> ()
    %cst_16 = arith.constant 0.176776692 : f32
    %26 = vector.broadcast %cst_16 : f32 to vector<2x8x8xf32>
    %27 = arith.mulf %25, %26 : vector<2x8x8xf32>
    %28 = vector.broadcast %4 : vector<2x1x8xf32> to vector<2x8x8xf32>
    %29 = arith.addf %27, %28 : vector<2x8x8xf32>
    %cst_17 = arith.constant dense<0xFF800000> : vector<2x8xf32>
    %30 = vector.multi_reduction <maximumf>, %29, %cst_17 [2] : vector<2x8x8xf32> to vector<2x8xf32>
    %31 = vector.shape_cast %30 : vector<2x8xf32> to vector<2x8x1xf32>
    %32 = vector.broadcast %31 : vector<2x8x1xf32> to vector<2x8x8xf32>
    %33 = arith.subf %29, %32 : vector<2x8x8xf32>
    %34 = math.exp %33 : vector<2x8x8xf32>
    %cst_18 = arith.constant dense<0.000000e+00> : vector<2x8xf32>
    %35 = vector.multi_reduction <add>, %34, %cst_18 [2] : vector<2x8x8xf32> to vector<2x8xf32>
    %36 = vector.shape_cast %35 : vector<2x8xf32> to vector<2x8x1xf32>
    %37 = tpu.reciprocal %36 {approx = true} : vector<2x8x1xf32> -> vector<2x8x1xf32>
    %38 = vector.broadcast %37 : vector<2x8x1xf32> to vector<2x8x8xf32>
    %39 = arith.mulf %34, %38 : vector<2x8x8xf32>
    %40 = arith.truncf %39 : vector<2x8x8xf32> to vector<2x8x8xbf16>
    %41 = vector.extract_strided_slice %22 {offsets = [0, 0, 0], sizes = [2, 8, 32], strides = [1, 1, 1]} : vector<2x8x128xbf16> to vector<2x8x32xbf16>
    "tpu.trace_start"() <{level = 10 : i32, message = "bqk,bkd->bqd"}> : () -> ()
    %cst_19 = arith.constant dense<0.000000e+00> : vector<2x8x32xf32>
    %42 = tpu.matmul %40, %41, %cst_19 {dimension_numbers = #tpu.dot_dimension_numbers<[2], [1], [1], [2], [0, 0, 0, 1, 1, 2], [0], [0]>} : vector<2x8x8xbf16>, vector<2x8x32xbf16>, vector<2x8x32xf32> -> vector<2x8x32xf32>
    "tpu.trace_stop"() : () -> ()
    %43 = arith.truncf %42 : vector<2x8x32xf32> to vector<2x8x32xbf16>
    %44 = vector.extract_strided_slice %18 {offsets = [0, 0, 32], sizes = [2, 8, 32], strides = [1, 1, 1]} : vector<2x8x128xbf16> to vector<2x8x32xbf16>
    %45 = vector.extract_strided_slice %20 {offsets = [0, 0, 32], sizes = [2, 8, 32], strides = [1, 1, 1]} : vector<2x8x128xbf16> to vector<2x8x32xbf16>
    "tpu.trace_start"() <{level = 10 : i32, message = "bqd,bkd->bqk"}> : () -> ()
    %cst_20 = arith.constant dense<0.000000e+00> : vector<2x8x8xf32>
    %46 = tpu.matmul %44, %45, %cst_20 {dimension_numbers = #tpu.dot_dimension_numbers<[2], [2], [1], [1], [0, 0, 0, 1, 1, 1], [0], [0]>} : vector<2x8x32xbf16>, vector<2x8x32xbf16>, vector<2x8x8xf32> -> vector<2x8x8xf32>
    "tpu.trace_stop"() : () -> ()
    %cst_21 = arith.constant 0.176776692 : f32
    %47 = vector.broadcast %cst_21 : f32 to vector<2x8x8xf32>
    %48 = arith.mulf %46, %47 : vector<2x8x8xf32>
    %49 = vector.broadcast %4 : vector<2x1x8xf32> to vector<2x8x8xf32>
    %50 = arith.addf %48, %49 : vector<2x8x8xf32>
    %cst_22 = arith.constant dense<0xFF800000> : vector<2x8xf32>
    %51 = vector.multi_reduction <maximumf>, %50, %cst_22 [2] : vector<2x8x8xf32> to vector<2x8xf32>
    %52 = vector.shape_cast %51 : vector<2x8xf32> to vector<2x8x1xf32>
    %53 = vector.broadcast %52 : vector<2x8x1xf32> to vector<2x8x8xf32>
    %54 = arith.subf %50, %53 : vector<2x8x8xf32>
    %55 = math.exp %54 : vector<2x8x8xf32>
    %cst_23 = arith.constant dense<0.000000e+00> : vector<2x8xf32>
    %56 = vector.multi_reduction <add>, %55, %cst_23 [2] : vector<2x8x8xf32> to vector<2x8xf32>
    %57 = vector.shape_cast %56 : vector<2x8xf32> to vector<2x8x1xf32>
    %58 = tpu.reciprocal %57 {approx = true} : vector<2x8x1xf32> -> vector<2x8x1xf32>
    %59 = vector.broadcast %58 : vector<2x8x1xf32> to vector<2x8x8xf32>
    %60 = arith.mulf %55, %59 : vector<2x8x8xf32>
    %61 = arith.truncf %60 : vector<2x8x8xf32> to vector<2x8x8xbf16>
    %62 = vector.extract_strided_slice %22 {offsets = [0, 0, 32], sizes = [2, 8, 32], strides = [1, 1, 1]} : vector<2x8x128xbf16> to vector<2x8x32xbf16>
    "tpu.trace_start"() <{level = 10 : i32, message = "bqk,bkd->bqd"}> : () -> ()
    %cst_24 = arith.constant dense<0.000000e+00> : vector<2x8x32xf32>
    %63 = tpu.matmul %61, %62, %cst_24 {dimension_numbers = #tpu.dot_dimension_numbers<[2], [1], [1], [2], [0, 0, 0, 1, 1, 2], [0], [0]>} : vector<2x8x8xbf16>, vector<2x8x32xbf16>, vector<2x8x32xf32> -> vector<2x8x32xf32>
    "tpu.trace_stop"() : () -> ()
    %64 = arith.truncf %63 : vector<2x8x32xf32> to vector<2x8x32xbf16>
    %65 = vector.extract_strided_slice %18 {offsets = [0, 0, 64], sizes = [2, 8, 32], strides = [1, 1, 1]} : vector<2x8x128xbf16> to vector<2x8x32xbf16>
    %66 = vector.extract_strided_slice %20 {offsets = [0, 0, 64], sizes = [2, 8, 32], strides = [1, 1, 1]} : vector<2x8x128xbf16> to vector<2x8x32xbf16>
    "tpu.trace_start"() <{level = 10 : i32, message = "bqd,bkd->bqk"}> : () -> ()
    %cst_25 = arith.constant dense<0.000000e+00> : vector<2x8x8xf32>
    %67 = tpu.matmul %65, %66, %cst_25 {dimension_numbers = #tpu.dot_dimension_numbers<[2], [2], [1], [1], [0, 0, 0, 1, 1, 1], [0], [0]>} : vector<2x8x32xbf16>, vector<2x8x32xbf16>, vector<2x8x8xf32> -> vector<2x8x8xf32>
    "tpu.trace_stop"() : () -> ()
    %cst_26 = arith.constant 0.176776692 : f32
    %68 = vector.broadcast %cst_26 : f32 to vector<2x8x8xf32>
    %69 = arith.mulf %67, %68 : vector<2x8x8xf32>
    %70 = vector.broadcast %4 : vector<2x1x8xf32> to vector<2x8x8xf32>
    %71 = arith.addf %69, %70 : vector<2x8x8xf32>
    %cst_27 = arith.constant dense<0xFF800000> : vector<2x8xf32>
    %72 = vector.multi_reduction <maximumf>, %71, %cst_27 [2] : vector<2x8x8xf32> to vector<2x8xf32>
    %73 = vector.shape_cast %72 : vector<2x8xf32> to vector<2x8x1xf32>
    %74 = vector.broadcast %73 : vector<2x8x1xf32> to vector<2x8x8xf32>
    %75 = arith.subf %71, %74 : vector<2x8x8xf32>
    %76 = math.exp %75 : vector<2x8x8xf32>
    %cst_28 = arith.constant dense<0.000000e+00> : vector<2x8xf32>
    %77 = vector.multi_reduction <add>, %76, %cst_28 [2] : vector<2x8x8xf32> to vector<2x8xf32>
    %78 = vector.shape_cast %77 : vector<2x8xf32> to vector<2x8x1xf32>
    %79 = tpu.reciprocal %78 {approx = true} : vector<2x8x1xf32> -> vector<2x8x1xf32>
    %80 = vector.broadcast %79 : vector<2x8x1xf32> to vector<2x8x8xf32>
    %81 = arith.mulf %76, %80 : vector<2x8x8xf32>
    %82 = arith.truncf %81 : vector<2x8x8xf32> to vector<2x8x8xbf16>
    %83 = vector.extract_strided_slice %22 {offsets = [0, 0, 64], sizes = [2, 8, 32], strides = [1, 1, 1]} : vector<2x8x128xbf16> to vector<2x8x32xbf16>
    "tpu.trace_start"() <{level = 10 : i32, message = "bqk,bkd->bqd"}> : () -> ()
    %cst_29 = arith.constant dense<0.000000e+00> : vector<2x8x32xf32>
    %84 = tpu.matmul %82, %83, %cst_29 {dimension_numbers = #tpu.dot_dimension_numbers<[2], [1], [1], [2], [0, 0, 0, 1, 1, 2], [0], [0]>} : vector<2x8x8xbf16>, vector<2x8x32xbf16>, vector<2x8x32xf32> -> vector<2x8x32xf32>
    "tpu.trace_stop"() : () -> ()
    %85 = arith.truncf %84 : vector<2x8x32xf32> to vector<2x8x32xbf16>
    %86 = vector.extract_strided_slice %18 {offsets = [0, 0, 96], sizes = [2, 8, 32], strides = [1, 1, 1]} : vector<2x8x128xbf16> to vector<2x8x32xbf16>
    %87 = vector.extract_strided_slice %20 {offsets = [0, 0, 96], sizes = [2, 8, 32], strides = [1, 1, 1]} : vector<2x8x128xbf16> to vector<2x8x32xbf16>
    "tpu.trace_start"() <{level = 10 : i32, message = "bqd,bkd->bqk"}> : () -> ()
    %cst_30 = arith.constant dense<0.000000e+00> : vector<2x8x8xf32>
    %88 = tpu.matmul %86, %87, %cst_30 {dimension_numbers = #tpu.dot_dimension_numbers<[2], [2], [1], [1], [0, 0, 0, 1, 1, 1], [0], [0]>} : vector<2x8x32xbf16>, vector<2x8x32xbf16>, vector<2x8x8xf32> -> vector<2x8x8xf32>
    "tpu.trace_stop"() : () -> ()
    %cst_31 = arith.constant 0.176776692 : f32
    %89 = vector.broadcast %cst_31 : f32 to vector<2x8x8xf32>
    %90 = arith.mulf %88, %89 : vector<2x8x8xf32>
    %91 = vector.broadcast %4 : vector<2x1x8xf32> to vector<2x8x8xf32>
    %92 = arith.addf %90, %91 : vector<2x8x8xf32>
    %cst_32 = arith.constant dense<0xFF800000> : vector<2x8xf32>
    %93 = vector.multi_reduction <maximumf>, %92, %cst_32 [2] : vector<2x8x8xf32> to vector<2x8xf32>
    %94 = vector.shape_cast %93 : vector<2x8xf32> to vector<2x8x1xf32>
    %95 = vector.broadcast %94 : vector<2x8x1xf32> to vector<2x8x8xf32>
    %96 = arith.subf %92, %95 : vector<2x8x8xf32>
    %97 = math.exp %96 : vector<2x8x8xf32>
    %cst_33 = arith.constant dense<0.000000e+00> : vector<2x8xf32>
    %98 = vector.multi_reduction <add>, %97, %cst_33 [2] : vector<2x8x8xf32> to vector<2x8xf32>
    %99 = vector.shape_cast %98 : vector<2x8xf32> to vector<2x8x1xf32>
    %100 = tpu.reciprocal %99 {approx = true} : vector<2x8x1xf32> -> vector<2x8x1xf32>
    %101 = vector.broadcast %100 : vector<2x8x1xf32> to vector<2x8x8xf32>
    %102 = arith.mulf %97, %101 : vector<2x8x8xf32>
    %103 = arith.truncf %102 : vector<2x8x8xf32> to vector<2x8x8xbf16>
    %104 = vector.extract_strided_slice %22 {offsets = [0, 0, 96], sizes = [2, 8, 32], strides = [1, 1, 1]} : vector<2x8x128xbf16> to vector<2x8x32xbf16>
    "tpu.trace_start"() <{level = 10 : i32, message = "bqk,bkd->bqd"}> : () -> ()
    %cst_34 = arith.constant dense<0.000000e+00> : vector<2x8x32xf32>
    %105 = tpu.matmul %103, %104, %cst_34 {dimension_numbers = #tpu.dot_dimension_numbers<[2], [1], [1], [2], [0, 0, 0, 1, 1, 2], [0], [0]>} : vector<2x8x8xbf16>, vector<2x8x32xbf16>, vector<2x8x32xf32> -> vector<2x8x32xf32>
    "tpu.trace_stop"() : () -> ()
    %106 = arith.truncf %105 : vector<2x8x32xf32> to vector<2x8x32xbf16>
    %107 = tpu.concatenate %43, %64, %85, %106 in 2 : vector<2x8x32xbf16>, vector<2x8x32xbf16>, vector<2x8x32xbf16>, vector<2x8x32xbf16> -> vector<2x8x128xbf16>
    %108 = vector.shape_cast %107 : vector<2x8x128xbf16> to vector<16x128xbf16>
    %c0_35 = arith.constant 0 : index
    %c0_36 = arith.constant 0 : index
    %c0_37 = arith.constant 0 : index
    %109 = vector.load %arg5[%c0_35, %c0_36, %c0_37] : memref<1x128x128xbf16, #tpu.memory_space<vmem>>, vector<1x128x128xbf16>
    %110 = vector.shape_cast %109 : vector<1x128x128xbf16> to vector<128x128xbf16>
    %cst_38 = arith.constant dense<0.000000e+00> : vector<16x128xf32>
    %111 = tpu.matmul %108, %110, %cst_38 {dimension_numbers = #tpu.dot_dimension_numbers<[1], [0], [0], [1], [0, 0, 1, 1], [], []>} : vector<16x128xbf16>, vector<128x128xbf16>, vector<16x128xf32> -> vector<16x128xf32>
    %112 = vector.extract_strided_slice %6 {offsets = [0, 0], sizes = [1, 128], strides = [1, 1]} : vector<6x128xf32> to vector<1x128xf32>
    %113 = vector.broadcast %112 : vector<1x128xf32> to vector<16x128xf32>
    %114 = arith.addf %111, %113 : vector<16x128xf32>
    %115 = arith.addf %7, %114 : vector<16x128xf32>
    %116 = vector.extract_strided_slice %6 {offsets = [1, 0], sizes = [1, 128], strides = [1, 1]} : vector<6x128xf32> to vector<1x128xf32>
    %117 = vector.extract_strided_slice %6 {offsets = [2, 0], sizes = [1, 128], strides = [1, 1]} : vector<6x128xf32> to vector<1x128xf32>
    %cst_39 = arith.constant dense<0.000000e+00> : vector<16xf32>
    %118 = vector.multi_reduction <add>, %115, %cst_39 [1] : vector<16x128xf32> to vector<16xf32>
    %119 = vector.shape_cast %118 : vector<16xf32> to vector<16x1xf32>
    %cst_40 = arith.constant 1.280000e+02 : f32
    %120 = vector.broadcast %cst_40 : f32 to vector<16x1xf32>
    %121 = arith.divf %119, %120 : vector<16x1xf32>
    %122 = arith.mulf %115, %115 : vector<16x128xf32>
    %cst_41 = arith.constant dense<0.000000e+00> : vector<16xf32>
    %123 = vector.multi_reduction <add>, %122, %cst_41 [1] : vector<16x128xf32> to vector<16xf32>
    %124 = vector.shape_cast %123 : vector<16xf32> to vector<16x1xf32>
    %cst_42 = arith.constant 1.280000e+02 : f32
    %125 = vector.broadcast %cst_42 : f32 to vector<16x1xf32>
    %126 = arith.divf %124, %125 : vector<16x1xf32>
    %127 = vector.broadcast %121 : vector<16x1xf32> to vector<16x128xf32>
    %128 = arith.subf %115, %127 : vector<16x128xf32>
    %129 = arith.mulf %121, %121 : vector<16x1xf32>
    %130 = arith.subf %126, %129 : vector<16x1xf32>
    %cst_43 = arith.constant 9.99999974E-6 : f32
    %131 = vector.broadcast %cst_43 : f32 to vector<16x1xf32>
    %132 = arith.addf %130, %131 : vector<16x1xf32>
    %133 = math.rsqrt %132 : vector<16x1xf32>
    %134 = vector.broadcast %133 : vector<16x1xf32> to vector<16x128xf32>
    %135 = arith.mulf %128, %134 : vector<16x128xf32>
    %136 = vector.broadcast %116 : vector<1x128xf32> to vector<16x128xf32>
    %137 = arith.mulf %135, %136 : vector<16x128xf32>
    %138 = vector.broadcast %117 : vector<1x128xf32> to vector<16x128xf32>
    %139 = arith.addf %137, %138 : vector<16x128xf32>
    %140 = arith.truncf %139 : vector<16x128xf32> to vector<16x128xbf16>
    %c0_44 = arith.constant 0 : index
    %c0_45 = arith.constant 0 : index
    %c0_46 = arith.constant 0 : index
    %141 = vector.load %arg6[%c0_44, %c0_45, %c0_46] : memref<1x128x256xbf16, #tpu.memory_space<vmem>>, vector<1x128x256xbf16>
    %142 = vector.shape_cast %141 : vector<1x128x256xbf16> to vector<128x256xbf16>
    %cst_47 = arith.constant dense<0.000000e+00> : vector<16x256xf32>
    %143 = tpu.matmul %140, %142, %cst_47 {dimension_numbers = #tpu.dot_dimension_numbers<[1], [0], [0], [1], [0, 0, 1, 1], [], []>} : vector<16x128xbf16>, vector<128x256xbf16>, vector<16x256xf32> -> vector<16x256xf32>
    %c0_48 = arith.constant 0 : index
    %c0_49 = arith.constant 0 : index
    %c0_50 = arith.constant 0 : index
    %144 = vector.load %arg9[%c0_48, %c0_49, %c0_50] : memref<1x1x256xf32, #tpu.memory_space<vmem>>, vector<1x1x256xf32>
    %145 = vector.shape_cast %144 : vector<1x1x256xf32> to vector<1x256xf32>
    %146 = vector.broadcast %145 : vector<1x256xf32> to vector<16x256xf32>
    %147 = arith.addf %143, %146 : vector<16x256xf32>
    %cst_51 = arith.constant 0.000000e+00 : f32
    %148 = vector.broadcast %cst_51 : f32 to vector<16x256xf32>
    %149 = arith.maximumf %147, %148 : vector<16x256xf32>
    %150 = arith.truncf %149 : vector<16x256xf32> to vector<16x256xbf16>
    %c0_52 = arith.constant 0 : index
    %c0_53 = arith.constant 0 : index
    %c0_54 = arith.constant 0 : index
    %151 = vector.load %arg7[%c0_52, %c0_53, %c0_54] : memref<1x256x128xbf16, #tpu.memory_space<vmem>>, vector<1x256x128xbf16>
    %152 = vector.shape_cast %151 : vector<1x256x128xbf16> to vector<256x128xbf16>
    %cst_55 = arith.constant dense<0.000000e+00> : vector<16x128xf32>
    %153 = tpu.matmul %150, %152, %cst_55 {dimension_numbers = #tpu.dot_dimension_numbers<[1], [0], [0], [1], [0, 0, 1, 1], [], []>} : vector<16x256xbf16>, vector<256x128xbf16>, vector<16x128xf32> -> vector<16x128xf32>
    %154 = vector.extract_strided_slice %6 {offsets = [5, 0], sizes = [1, 128], strides = [1, 1]} : vector<6x128xf32> to vector<1x128xf32>
    %155 = vector.broadcast %154 : vector<1x128xf32> to vector<16x128xf32>
    %156 = arith.addf %153, %155 : vector<16x128xf32>
    %157 = arith.addf %139, %156 : vector<16x128xf32>
    %158 = vector.extract_strided_slice %6 {offsets = [3, 0], sizes = [1, 128], strides = [1, 1]} : vector<6x128xf32> to vector<1x128xf32>
    %159 = vector.extract_strided_slice %6 {offsets = [4, 0], sizes = [1, 128], strides = [1, 1]} : vector<6x128xf32> to vector<1x128xf32>
    %cst_56 = arith.constant dense<0.000000e+00> : vector<16xf32>
    %160 = vector.multi_reduction <add>, %157, %cst_56 [1] : vector<16x128xf32> to vector<16xf32>
    %161 = vector.shape_cast %160 : vector<16xf32> to vector<16x1xf32>
    %cst_57 = arith.constant 1.280000e+02 : f32
    %162 = vector.broadcast %cst_57 : f32 to vector<16x1xf32>
    %163 = arith.divf %161, %162 : vector<16x1xf32>
    %164 = arith.mulf %157, %157 : vector<16x128xf32>
    %cst_58 = arith.constant dense<0.000000e+00> : vector<16xf32>
    %165 = vector.multi_reduction <add>, %164, %cst_58 [1] : vector<16x128xf32> to vector<16xf32>
    %166 = vector.shape_cast %165 : vector<16xf32> to vector<16x1xf32>
    %cst_59 = arith.constant 1.280000e+02 : f32
    %167 = vector.broadcast %cst_59 : f32 to vector<16x1xf32>
    %168 = arith.divf %166, %167 : vector<16x1xf32>
    %169 = vector.broadcast %163 : vector<16x1xf32> to vector<16x128xf32>
    %170 = arith.subf %157, %169 : vector<16x128xf32>
    %171 = arith.mulf %163, %163 : vector<16x1xf32>
    %172 = arith.subf %168, %171 : vector<16x1xf32>
    %cst_60 = arith.constant 9.99999974E-6 : f32
    %173 = vector.broadcast %cst_60 : f32 to vector<16x1xf32>
    %174 = arith.addf %172, %173 : vector<16x1xf32>
    %175 = math.rsqrt %174 : vector<16x1xf32>
    %176 = vector.broadcast %175 : vector<16x1xf32> to vector<16x128xf32>
    %177 = arith.mulf %170, %176 : vector<16x128xf32>
    %178 = vector.broadcast %158 : vector<1x128xf32> to vector<16x128xf32>
    %179 = arith.mulf %177, %178 : vector<16x128xf32>
    %180 = vector.broadcast %159 : vector<1x128xf32> to vector<16x128xf32>
    %181 = arith.addf %179, %180 : vector<16x128xf32>
    %182 = vector.shape_cast %181 : vector<16x128xf32> to vector<2x8x128xf32>
    %c0_61 = arith.constant 0 : index
    %c0_62 = arith.constant 0 : index
    %c0_63 = arith.constant 0 : index
    %183 = vector.load %arg11[%c0_61, %c0_62, %c0_63] : memref<2x8x128xf32, #tpu.memory_space<vmem>>, vector<2x8x128xf32>
    tpu.vector_store %arg11[%c0_61, %c0_62, %c0_63], %182 {strides = array<i32>} : memref<2x8x128xf32, #tpu.memory_space<vmem>>, vector<2x8x128xf32>,
    return
  }
  func.func @transform_0(%arg0: i32, %arg1: i32) -> (i32, i32, i32) {
    %c0_i32 = arith.constant 0 : i32
    %c0_i32_0 = arith.constant 0 : i32
    %c0_i32_1 = arith.constant 0 : i32
    return %arg0, %c0_i32, %c0_i32_0 : i32, i32, i32
  }
  func.func @transform_1(%arg0: i32, %arg1: i32) -> (i32, i32, i32) {
    %c0_i32 = arith.constant 0 : i32
    %c0_i32_0 = arith.constant 0 : i32
    %c0_i32_1 = arith.constant 0 : i32
    return %arg0, %c0_i32, %c0_i32_0 : i32, i32, i32
  }
  func.func @transform_2(%arg0: i32, %arg1: i32) -> (i32, i32, i32) {
    %c0_i32 = arith.constant 0 : i32
    %c0_i32_0 = arith.constant 0 : i32
    %c0_i32_1 = arith.constant 0 : i32
    return %arg1, %c0_i32, %c0_i32_0 : i32, i32, i32
  }
  func.func @transform_3(%arg0: i32, %arg1: i32) -> (i32, i32, i32) {
    %c0_i32 = arith.constant 0 : i32
    %c0_i32_0 = arith.constant 0 : i32
    %c0_i32_1 = arith.constant 0 : i32
    return %arg1, %c0_i32, %c0_i32_0 : i32, i32, i32
  }
  func.func @transform_4(%arg0: i32, %arg1: i32) -> (i32, i32, i32) {
    %c0_i32 = arith.constant 0 : i32
    %c0_i32_0 = arith.constant 0 : i32
    %c0_i32_1 = arith.constant 0 : i32
    return %arg1, %c0_i32, %c0_i32_0 : i32, i32, i32
  }
  func.func @transform_5(%arg0: i32, %arg1: i32) -> (i32, i32, i32) {
    %c0_i32 = arith.constant 0 : i32
    %c0_i32_0 = arith.constant 0 : i32
    %c0_i32_1 = arith.constant 0 : i32
    return %arg1, %c0_i32, %c0_i32_0 : i32, i32, i32
  }
  func.func @transform_6(%arg0: i32, %arg1: i32) -> (i32, i32, i32) {
    %c0_i32 = arith.constant 0 : i32
    %c0_i32_0 = arith.constant 0 : i32
    %c0_i32_1 = arith.constant 0 : i32
    return %arg1, %c0_i32, %c0_i32_0 : i32, i32, i32
  }
  func.func @transform_7(%arg0: i32, %arg1: i32) -> (i32, i32, i32) {
    %c0_i32 = arith.constant 0 : i32
    %c0_i32_0 = arith.constant 0 : i32
    %c0_i32_1 = arith.constant 0 : i32
    return %arg1, %c0_i32, %c0_i32_0 : i32, i32, i32
  }
  func.func @transform_8(%arg0: i32, %arg1: i32) -> (i32, i32, i32) {
    %c0_i32 = arith.constant 0 : i32
    %c0_i32_0 = arith.constant 0 : i32
    %c0_i32_1 = arith.constant 0 : i32
    return %arg1, %c0_i32, %c0_i32_0 : i32, i32, i32
  }
  func.func @transform_9(%arg0: i32, %arg1: i32) -> (i32, i32, i32) {
    %c0_i32 = arith.constant 0 : i32
    %c0_i32_0 = arith.constant 0 : i32
    %c0_i32_1 = arith.constant 0 : i32
    return %arg0, %c0_i32, %c0_i32_0 : i32, i32, i32
  }
}

</mosaic_0001>

<bundles_post_ra>
// kernel: tpu_custom_call.1
= control target key start
LH: loop header
LB: loop body
LE: loop exit
PB: predicated region body
PF: predicated region fallthrough
CT: control target
= control target key end

     0   :  { %s3259_s0 = inlined_call_operand.vmem [shape: f32[2,8,128], index: 0, kind: input, shape index: {}]   ;;  %s3260_s1 = inlined_call_operand.vmem [shape: f32[2,1,8], index: 1, kind: input, shape index: {}]   ;;  %s3261_s2 = inlined_call_operand.hbm [shape: bf16[2,128,384], index: 2, kind: input, shape index: {}]   ;;  %s3262_s3 = inlined_call_operand.hbm [shape: bf16[2,128,128], index: 3, kind: input, shape index: {}]   ;;  %s3263_s4 = inlined_call_operand.hbm [shape: bf16[2,128,256], index: 4, kind: input, shape index: {}]   ;;  %s3264_s5 = inlined_call_operand.hbm [shape: bf16[2,256,128], index: 5, kind: input, shape index: {}]   ;;  %s3265_s6 = inlined_call_operand.vmem [shape: f32[2,1,384], index: 6, kind: input, shape index: {}]   ;;  %s3266_s7 = inlined_call_operand.vmem [shape: f32[2,1,256], index: 7, kind: input, shape index: {}]   ;;  %s3267_s8 = inlined_call_operand.vmem [shape: f32[2,6,128], index: 8, kind: input, shape index: {}]   ;;  %s3268_s9 = inlined_call_operand.hbm [shape: f32[2,8,128], index: 9, kind: output, shape index: {}]  }
   0x1   :  { %3276 = sst [smem:[#allocation19_spill]] %s3259_s0 }
   0x2   :  { %3277 = sst [smem:[#allocation20_spill]] %s3260_s1 }
   0x3   :  { %3278 = sst [smem:[#allocation21_spill]] %s3261_s2 }
   0x4   :  { %3279 = sst [smem:[#allocation22_spill]] %s3262_s3 }
   0x5   :  { %3280 = sst [smem:[#allocation23_spill]] %s3268_s9 }
   0x6   :  { %14 = vsyncpa [#allocation3], 0 }
   0x7   :  { %16 = vsyncpa [#allocation3 + $0x1], 0 }
   0x8   :  { %17 = vsyncpa [#allocation6], 0 }
   0x9   :  { %19 = vsyncpa [#allocation6 + $0x1], 0 }
   0xa   :  { %20 = vsyncpa [#allocation9], 0 }
   0xb   :  { %22 = vsyncpa [#allocation9 + $0x1], 0 }
   0xc   :  { %23 = vsyncpa [#allocation4], 0  ;;  %s2809_s30 = smov 0   ;;  %s2811_s10 = smov 0  }
   0xd   :  { %s2813_s11 = smov 0   ;;  %s2815_s12 = smov 0  }
   0xe   :  { %s2817_s13 = smov 0   ;;  %s2819_s14 = smov 0  }
   0xf LB: > { %3281 = sst [smem:[#allocation15_spill]] %s2732_s11  ;;  %s2838_s15 = sadd.s32 4294967295, %s2744_s14   ;;  %s2744_s14 = sphi %s2819_s14, %s29_s14   ;;  %s2740_s13 = sphi %s2817_s13, %s3303_s13   ;;  %s2736_s12 = sphi %s2815_s12, %s3302_s12   ;;  %s2732_s11 = sphi %s2813_s11, %s3298_s11   ;;  %s2728_s10 = sphi %s2811_s10, %s3301_s10   ;;  %s2724_s30 = sphi %s2809_s30, %s3300_s30  }
  0x10   : > { %3282 = sst [smem:[#allocation16_spill]] %s2744_s14  ;;  %s38_s16 = sadd.s32 1, %s2740_s13 }
  0x11   : > { %p39_p0 = scmp.ge.s32.totalorder %s38_s16, 2  ;;  %s100_s17 = sadd.s32 1, %s2732_s11 }
  0x12   : > { %p107_p1 = scmp.ne.s32.totalorder %s2732_s11, %s2728_s10  ;;  %p108_p2 = scmp.eq.s32.totalorder %s2744_s14, 0 }
  0x13   : > { %s3305_s16 = smov (%p39_p0, %s38_s16), 0  ;;  %p113_p4 = scmp.ne.s32.totalorder %s2728_s10, %s2724_s30 }
  0x14   : > { %3283 = sst [smem:[#allocation17_spill]] %s3305_s16  ;;  %p109_p3 = por %p108_p2, %p107_p1 }
  0x15   : > { %s97_s18 = ssub.s32 %s2740_s13, %s3305_s16  ;;  %p114_p5 = scmp.eq.s32.totalorder %s2838_s15, 0 }
  0x16   : > { %p98_p6 = scmp.eq.s32.totalorder %s97_s18, 0  ;;  %p2426_p8 = scmp.lt.s32.totalorder %s2744_s14, 2 }
  0x17   : > { %p2851_p7 = por %p114_p5, %p113_p4  ;;  %s2860_s21 = sand.u32 1, %s2732_s11  }
  0x18   : > { %s2857_s20 = scalar_select %p98_p6, %s2732_s11, %s100_s17  }
  0x19   : > { %p2862_p9 = pnand %p2426_p8, %p109_p3  ;;  %s358_s23 = sand.u32 1, %s2744_s14  }
  0x1a   : > { %3285 = sst [smem:[#allocation18_spill]] %s2857_s20  ;;  %s2038_s24 = sshll.u32 %s2860_s21, 6 }
  0x1b   : > { %s2330_s25 = sshll.u32 %s2740_s13, 6  ;;  %s3287_s3 = sld [smem:[#allocation22_spill]] }
  0x1c   : > { %s362_s29 = scalar_lea.vmem [#allocation5], %s2038_s24  ;;  %p2047_p10 = scmp.ge.s32.totalorder %s2744_s14, 1 }
  0x1d   : > { %s370_s30 = sshll.u32 %s362_s29, 4  ;;  %s2873_s18 = scalar_lea.sflag [#allocation6], %s358_s23  ;;  %s371_s30 = int_to_ptr.vmem [resolvable:$true] %s370_s30 }
  0x1e   : > { %s3271_s16 = smov 64   ;;  %s3272_s20 = smov 4  }
  0x1f   : > { %p443_p11 = scmp.lt.s32.totalorder %s2744_s14, 3  ;;  %s2398_s26 = smul.u32 192, %s2740_s13 }
  0x20   : > { %s3289_s2 = sld [smem:[#allocation21_spill]]  ;;  %s2331_s14 = sshll.u32 %s2740_s13, 7 }
  0x21   : > { %s367_s28 = scalar_lea.hbm %s3287_s3, %s2330_s25  ;;  %p2882_p12 = pnand %p2047_p10, %p443_p11 }
  0x22   : > { %s368_s17 = sshll.u32 %s367_s28, 4  ;;  %s2397_s25 = smul.u32 192, %s2860_s21  ;;  %s369_s17 = int_to_ptr.hbm [resolvable:$true] %s368_s17 }
  0x23   : > { %2419 = dma.hbm_to_vmem [thread:$0]  (!%p2862_p9), %s369_s17, 1024, %s371_s30, %s2873_s18, %s3271_s16, %s3271_s16, %s3272_s20  }
  0x24   : > { %s340_s29 = scalar_lea.vmem [#allocation2], %s2397_s25  ;;  %s2041_s30 = sshll.u32 %s2860_s21, 7 }
  0x25   : > { %s348_s3 = sshll.u32 %s340_s29, 4  ;;  %s337_s17 = scalar_lea.sflag [#allocation3], %s2860_s21  ;;  %s349_s3 = int_to_ptr.vmem [resolvable:$true] %s348_s3 }
  0x26   : > { %s345_s28 = scalar_lea.hbm %s3289_s2, %s2398_s26  ;;  %s2748_s16 = smov 192  }
  0x27   : > { %s346_s11 = sshll.u32 %s345_s28, 4  ;;  %s2749_s20 = smov 12   ;;  %s347_s11 = int_to_ptr.hbm [resolvable:$true] %s346_s11 }
  0x28   : > { %2416 = dma.hbm_to_vmem [thread:$0]  (!%p2862_p9), %s347_s11, 3072, %s349_s3, %s337_s17, %s2748_s16, %s2748_s16, %s2749_s20  }
  0x29   : > { %s389_s27 = scalar_lea.hbm %s3263_s4, %s2331_s14  ;;  %s384_s25 = scalar_lea.vmem [#allocation7], %s2041_s30 }
  0x2a   : > { %s392_s26 = sshll.u32 %s384_s25, 4  ;;  %s390_s23 = sshll.u32 %s389_s27, 4  ;;  %s393_s26 = int_to_ptr.vmem [resolvable:$true] %s392_s26  ;;  %s391_s23 = int_to_ptr.hbm [resolvable:$true] %s390_s23 }
  0x2b   : > { %s2750_s28 = smov 128   ;;  %s2751_s29 = smov 8  }
  0x2c   : > { %2422 = dma.hbm_to_vmem [thread:$0]  (!%p2862_p9), %s391_s23, 2048, %s393_s26, %s2873_s18, %s2750_s28, %s2750_s28, %s2751_s29  }
  0x2d   : > { %s411_s3 = scalar_lea.hbm %s3264_s5, %s2331_s14  ;;  %s406_s16 = scalar_lea.vmem [#allocation8], %s2041_s30 }
  0x2e   : > { %s412_s11 = sshll.u32 %s411_s3, 4  ;;  %s414_s20 = sshll.u32 %s406_s16, 4  ;;  %s413_s11 = int_to_ptr.hbm [resolvable:$true] %s412_s11  ;;  %s415_s20 = int_to_ptr.vmem [resolvable:$true] %s414_s20 }
  0x2f   : > { %s403_s1 = scalar_lea.sflag [#allocation9], %s2860_s21  ;;  %s3290_s9 = smov 4  }
  0x30   : > { %s3291_s17 = smov 64   ;;  %447 = sbr.rel (%p2882_p12) target bundleno = 1800 (0x708), region = 56 }
  0x31   : > { %2425 = dma.hbm_to_vmem [thread:$0]  (!%p2862_p9), %s413_s11, 2048, %s415_s20, %s403_s1, %s3291_s17, %s3291_s17, %s3290_s9  }
  0x32   : > { %s449_s18 = sand.u32 (!%p2882_p12), 1, %s2728_s10  }
  0x33   : > { %s2399_s27 = smul.u32 (!%p2882_p12), 192, %s449_s18  ;;  %s450_s0 = scalar_lea.sflag (!%p2882_p12), [#allocation3], %s449_s18 }
  0x35   : > { %s2914_s2 = scalar_lea.vmem [#allocation2], %s2399_s27 }
  0x36   : > { %2707 = dma.done.wait (%p2851_p7), %s450_s0, 3072  }
  0x37   : > { %2709 = vsyncadd (%p2851_p7), %s450_s0, 4294964224  ;;  %s459_s14 = sand.u32 1, %s2838_s15   ;;  %s2048_s21 = sshll.u32 %s449_s18, 6 }
  0x38   : > { %s460_s22 = scalar_lea.sflag [#allocation6], %s459_s14  ;;  %s2921_s30 = scalar_lea.vmem [#allocation5], %s2048_s21 }
  0x39   : > { %2711 = dma.done.wait (%p2851_p7), %s460_s22, 3072  }
  0x3a   : > { %2713 = vsyncadd (%p2851_p7), %s460_s22, 4294964224  ;;  %s2049_s24 = sshll.u32 %s449_s18, 7  ;;  %s480_s26 = scalar_lea.sflag [#allocation9], %s449_s18 }
  0x3b   : > { %s2927_s25 = scalar_lea.vmem [#allocation7], %s2049_s24  ;;  %s2929_s23 = scalar_lea.vmem [#allocation8], %s2049_s24 }
  0x3c   : > { %2715 = dma.done.wait (%p2851_p7), %s480_s26, 2048  }
  0x3d   : > { %2717 = vsyncadd (%p2851_p7), %s480_s26, 4294965248  ;;  %p561_p13 = scmp.lt.s32.totalorder %s2736_s12, 1  ;;  %p2053_p0 = scmp.ne.s32.totalorder %s2736_s12, 0 }
  0x3e   : > { %s3292_s22 = sld [smem:[#allocation19_spill]] (!%p2053_p0) }
  0x3f   : > { %s562_s28 = scalar_select %p561_p13, %s2736_s12, 1 }
  0x40   : > { %578 = sbr.rel (%p2053_p0) target bundleno = 72 (0x48), region = 76 }
  0x41   : > { %s2400_s29 = smul.u32 3, %s562_s28  ;;  %s2051_s3 = sshll.u32 %s562_s28, 1 }
  0x42   : > { %s2940_s20 = scalar_lea.vmem %s3266_s7, %s2051_s3  ;;  %s2052_s1 = sshll.u32 %s562_s28, 3 }
  0x43   : > { %s2945_s18 = scalar_lea.vmem %s3265_s6, %s2400_s29  ;;  %s2950_s0 = scalar_lea.vmem %s3267_s8, %s2052_s1 }
  0x45   : > { %v579_v0 = vld [vmem:[%s3292_s22] sm:$0xff]  ;;  %v580_v1 = vld [vmem:[%s3292_s22 + $0x8] sm:$0xff] }
  0x46   : > { %581 = vst [vmem:[#allocation10] sm:$0xff] %v579_v0 }
  0x47   : > { %582 = vst [vmem:[#allocation10 + $0x8] sm:$0xff] %v580_v1 }
  0x48 PF: > { %v2140_v2 = vld [vmem:[%s2914_s2 + $0xa8] sm:$0xf]  ;;  %v2355_v3 = vld [vmem:[%s2914_s2 + $0xb0] sm:$0xf0]  ;;  %v2354_v4 = vld [vmem:[%s2914_s2 + $0xac] sm:$0xf] }
  0x49   : > { %v2141_v5 = vor.u32 %v2355_v3, %v2140_v2  ;;  %v2142_v6 = vld [vmem:[%s2914_s2 + $0xb4] sm:$0xf0]  ;;  %v2128_v7 = vld [vmem:[%s2914_s2 + $0x90] sm:$0xf]  ;;  %v2352_v8 = vld [vmem:[%s2914_s2 + $0x98] sm:$0xf0] }
  0x4a   : > { %v2145_v9 = vor.u32 %v2354_v4, %v2142_v6  ;;  %v2351_v10 = vld [vmem:[%s2914_s2 + $0x94] sm:$0xf]  ;;  %v2130_v11 = vld [vmem:[%s2914_s2 + $0x9c] sm:$0xf0]  ;;  %v2129_v12 = vor.u32 %v2352_v8, %v2128_v7  ;;  %v2116_v14 = vld [vmem:[%s2914_s2 + $0x78] sm:$0xf] }
  0x4b   : > { %757 = vmatpush.bf16.msra.mxu0 %v2141_v5  ;;  %v2133_v13 = vor.u32 %v2351_v10, %v2130_v11  ;;  %v2349_v15 = vld [vmem:[%s2914_s2 + $0x80] sm:$0xf0]  ;;  %v2348_v16 = vld [vmem:[%s2914_s2 + $0x7c] sm:$0xf]  ;;  %v2118_v17 = vld [vmem:[%s2914_s2 + $0x84] sm:$0xf0] }
  0x4c   : > { %771 = vmatpush.bf16.msra.mxu1 %v2145_v9  ;;  %v2117_v18 = vor.u32 %v2349_v15, %v2116_v14  ;;  %v2121_v19 = vor.u32 %v2348_v16, %v2118_v17  ;;  %v2104_v20 = vld [vmem:[%s2914_s2 + $0x60] sm:$0xf]  ;;  %v2346_v21 = vld [vmem:[%s2914_s2 + $0x68] sm:$0xf0]  ;;  %v2345_v22 = vld [vmem:[%s2914_s2 + $0x64] sm:$0xf] }
  0x4d   : > { %v2106_v23 = vld [vmem:[%s2914_s2 + $0x6c] sm:$0xf0]  ;;  %v2105_v24 = vor.u32 %v2346_v21, %v2104_v20  ;;  %v2092_v26 = vld [vmem:[%s2914_s2 + $0x48] sm:$0xf]  ;;  %v2343_v27 = vld [vmem:[%s2914_s2 + $0x50] sm:$0xf0] }
  0x4e   : > { %v2109_v25 = vor.u32 %v2345_v22, %v2106_v23  ;;  %v2342_v28 = vld [vmem:[%s2914_s2 + $0x4c] sm:$0xf]  ;;  %v2094_v29 = vld [vmem:[%s2914_s2 + $0x54] sm:$0xf0]  ;;  %v2093_v30 = vor.u32 %v2343_v27, %v2092_v26  ;;  %v2080_v32 = vld [vmem:[%s2914_s2 + $0x30] sm:$0xf] }
  0x4f   : > { %758 = vmatpush.bf16.msra.mxu0 %v2129_v12  ;;  %v2097_v31 = vor.u32 %v2342_v28, %v2094_v29  ;;  %v2340_v33 = vld [vmem:[%s2914_s2 + $0x38] sm:$0xf0]  ;;  %v2339_v34 = vld [vmem:[%s2914_s2 + $0x34] sm:$0xf]  ;;  %v2082_v35 = vld [vmem:[%s2914_s2 + $0x3c] sm:$0xf0] }
  0x50   : > { %772 = vmatpush.bf16.msra.mxu1 %v2133_v13  ;;  %v2081_v36 = vor.u32 %v2340_v33, %v2080_v32  ;;  %v2085_v37 = vor.u32 %v2339_v34, %v2082_v35  ;;  %v2068_v38 = vld [vmem:[%s2914_s2 + $0x18] sm:$0xf]  ;;  %v2337_v39 = vld [vmem:[%s2914_s2 + $0x20] sm:$0xf0]  ;;  %v2336_v40 = vld [vmem:[%s2914_s2 + $0x1c] sm:$0xf] }
  0x51   : > { %v2070_v41 = vld [vmem:[%s2914_s2 + $0x24] sm:$0xf0]  ;;  %v2069_v42 = vor.u32 %v2337_v39, %v2068_v38  ;;  %v2056_v44 = vld [vmem:[%s2914_s2] sm:$0xf]  ;;  %v2334_v45 = vld [vmem:[%s2914_s2 + $0x8] sm:$0xf0] }
  0x52   : > { %v2073_v43 = vor.u32 %v2336_v40, %v2070_v41  ;;  %v2333_v46 = vld [vmem:[%s2914_s2 + $0x4] sm:$0xf]  ;;  %v2058_v47 = vld [vmem:[%s2914_s2 + $0xc] sm:$0xf0]  ;;  %v2057_v48 = vor.u32 %v2334_v45, %v2056_v44  ;;  %v2993_v50 = vld [vmem:[#allocation10 + $0x8] sm:$0xff]  ;;  %vm807_vm0 = vcmask 261120  }
  0x53   : > { %759 = vmatpush.bf16.msra.mxu0 %v2117_v18  ;;  %v2991_v49 = vld [vmem:[#allocation10] sm:$0xff]  ;;  %v2061_v51 = vor.u32 %v2333_v46, %v2058_v47  ;;  %s2752_s12 = smov 64   ;;  %s2753_s28 = smov 96   ;;  %v2148_v6 = vld [vmem:[%s2914_s2 + $0xb0] sm:$0xf]  ;;  %vm856_vm1 = vcmask 64512  }
  0x54   : > { %773 = vmatpush.bf16.msra.mxu1 %v2121_v19  ;;  %v2997_v52 = vpack.c.bf16 %v2993_v50, %v2991_v49  ;;  %v3002_v53 = vld [vmem:[%s2945_s18] sm:$0x7]  ;;  %v2356_v7 = vld [vmem:[%s2914_s2 + $0xb8] sm:$0xf0]  ;;  %v2136_v9 = vld [vmem:[%s2914_s2 + $0x98] sm:$0xf] }
  0x55   : > { %v623_v54 = vperm.slane %v3002_v53, 0  ;;  %v624_v55 = vperm.slane %v3002_v53, 1  ;;  %v2149_v8 = vor.u32 %v2356_v7, %v2148_v6  ;;  %v2353_v10 = vld [vmem:[%s2914_s2 + $0xa0] sm:$0xf0]  ;;  %v2124_v16 = vld [vmem:[%s2914_s2 + $0x80] sm:$0xf] }
  0x56   : > { %v2137_v13 = vor.u32 %v2353_v10, %v2136_v9  ;;  %v2350_v17 = vld [vmem:[%s2914_s2 + $0x88] sm:$0xf0]  ;;  %v2112_v21 = vld [vmem:[%s2914_s2 + $0x68] sm:$0xf]  ;;  %v2347_v22 = vld [vmem:[%s2914_s2 + $0x70] sm:$0xf0] }
  0x57   : > { %760 = vmatpush.bf16.msra.mxu0 %v2105_v24  ;;  %785 = vmatpush.bf16.msra.mxu2 %v2149_v8  ;;  %v2125_v20 = vor.u32 %v2350_v17, %v2124_v16  ;;  %v2113_v24 = vor.u32 %v2347_v22, %v2112_v21  ;;  %v2344_v26 = vld [vmem:[%s2914_s2 + $0x58] sm:$0xf0]  ;;  %s2754_s29 = smov 32   ;;  %v2088_v29 = vld [vmem:[%s2914_s2 + $0x38] sm:$0xf]  ;;  %s3293_s11 = sld [smem:[#allocation20_spill]] }
  0x58   : > { %774 = vmatpush.bf16.msra.mxu1 %v2109_v25  ;;  %v2100_v25 = vld [vmem:[%s2914_s2 + $0x50] sm:$0xf]  ;;  %v2076_v32 = vld [vmem:[%s2914_s2 + $0x20] sm:$0xf]  ;;  %v2338_v33 = vld [vmem:[%s2914_s2 + $0x28] sm:$0xf0] }
  0x59   : > { %v2101_v28 = vor.u32 %v2344_v26, %v2100_v25  ;;  %v2077_v34 = vor.u32 %v2338_v33, %v2076_v32  ;;  %v2064_v35 = vld [vmem:[%s2914_s2 + $0x8] sm:$0xf]  ;;  %v625_v7 = vperm.slane %v3002_v53, 2  ;;  %vm884_vm2 = vcmask 1043456   ;;  %s3295_s17 = sld [smem:[#allocation23_spill]]  ;;  %p2427_p1 = scmp.eq.s32.totalorder %s2838_s15, 1 }
  0x5a   : > { %vm1326_vm3 = vcmask 523264   ;;  %vm1331_vm4 = vcmask 785408   ;;  %s2757_s27 = smov 128   ;;  %s2758_s19 = smov 8  }
  0x5b   : > { %761 = vmatpush.bf16.msra.mxu0 %v2093_v30  ;;  %786 = vmatpush.bf16.msra.mxu2 %v2137_v13  ;;  %v2341_v30 = vld [vmem:[%s2914_s2 + $0x40] sm:$0xf0] }
  0x5c   : > { %775 = vmatpush.bf16.msra.mxu1 %v2097_v31  ;;  %v2089_v31 = vor.u32 %v2341_v30, %v2088_v29 }
  0x5d   : > { %s3294_s16 = smov %s3293_s11 }
  0x5f   : > { %762 = vmatpush.bf16.msra.mxu0 %v2081_v36  ;;  %787 = vmatpush.bf16.msra.mxu2 %v2125_v20  ;;  %v2335_v36 = vld [vmem:[%s2914_s2 + $0x10] sm:$0xf0]  ;;  %s1838_s18 = sshll.u32 %s3295_s17, 4  ;;  %s1839_s18 = int_to_ptr.hbm [resolvable:$true] %s1838_s18 }
  0x60   : > { %776 = vmatpush.bf16.msra.mxu1 %v2085_v37  ;;  %v2065_v37 = vor.u32 %v2335_v36, %v2064_v35 }
  0x63   : > { %763 = vmatpush.bf16.msra.mxu0 %v2069_v42  ;;  %788 = vmatpush.bf16.msra.mxu2 %v2113_v24 }
  0x64   : > { %777 = vmatpush.bf16.msra.mxu1 %v2073_v43 }
  0x67   : > { %764 = vmatpush.bf16.msra.mxu0 %v2057_v48  ;;  %789 = vmatpush.bf16.msra.mxu2 %v2101_v28 }
  0x68   : > { %778 = vmatpush.bf16.msra.mxu1 %v2061_v51 }
  0x6a   : > { %765 = vmatmul.bf16.vlgmr.msra.gmra.mxu0 %v2997_v52 }
  0x6b   : > { %779 = vmatmul.bf16.vlgmr.msra.gmra.mxu1 %v2997_v52  ;;  %790 = vmatpush.bf16.msra.mxu2 %v2089_v31 }
  0x6f   : > { %791 = vmatpush.bf16.msra.mxu2 %v2077_v34 }
  0x73   : > { %792 = vmatpush.bf16.msra.mxu2 %v2065_v37 }
  0x76   : > { %793 = vmatmul.bf16.vlgmr.msra.gmra.mxu2 %v2997_v52 }
  0xe7   : > { %v766_v56 = vpop.f32.mrf.mxu0 }
  0xe8   : > { %v767_v57 = vadd.f32 %v766_v56, %v623_v54  ;;  %v780_v58 = vpop.f32.mrf.mxu1 }
  0xe9   : > { %v781_v59 = vadd.f32 %v780_v58, %v624_v55 }
  0xeb   : > { %v799_v60 = vpack.c.bf16 %v781_v59, %v767_v57 }
  0xed   : > { %v805_v61 = vrot.slane %v799_v60, 4  ;;  %v922_v12 = vunpack.c.l.b16 %v799_v60 }
  0xef   : > { %v768_v62 = vpop.f32.mrf.mxu0  ;;  %v812_v63 = vsel %vm807_vm0, %v805_v61, 0  ;;  %v926_v0 = vunpack.c.l.b16 %v805_v61  ;;  %v923_v19 = vpack.c.b16 %v922_v12, %v922_v12 }
  0xf0   : > { %v769_v1 = vadd.f32 %v768_v62, %v623_v54  ;;  %v782_v2 = vpop.f32.mrf.mxu1  ;;  %821 = vmatpush.bf16.xpose.msra.mxu3 %v812_v63  ;;  %v3049_v54 = vld [vmem:[%s3293_s11] ss:$0 sm:$0xff] }
  0xf1   : > { %v783_v3 = vadd.f32 %v782_v2, %v624_v55  ;;  %v927_v4 = vpack.c.b16 %v926_v0, %v926_v0  ;;  %v3059_v0 = vld [vmem:[%s3294_s16 + $0x1] ss:$0 sm:$0xff] }
  0xf3   : > { %v801_v5 = vpack.c.bf16 %v783_v3, %v769_v1  ;;  %1056 = vrot.lane.b32.xlu2 %v927_v4, %s2752_s12  ;;  %928 = vrot.lane.b32.xlu0 %v927_v4, %s2753_s28 }
  0xf5   : > { %v806_v11 = vrot.slane %v801_v5, 4  ;;  %v949_v23 = vunpack.c.l.b16 %v801_v5 }
  0xf7   : > { %2150 = vmatmul.msk.bf16.vlgmr.msra.gmra.mxu3 %vm807_vm0, %v799_v60  ;;  %v831_v14 = vsel %vm807_vm0, %v806_v11, 0  ;;  %v953_v15 = vunpack.c.l.b16 %v806_v11  ;;  %v950_v27 = vpack.c.b16 %v949_v23, %v949_v23 }
  0xf8   : > { %840 = vmatpush.bf16.xpose.msrb.mxu3 %v831_v14 }
  0xf9   : > { %v954_v18 = vpack.c.b16 %v953_v15, %v953_v15  ;;  %v794_v8 = vpop.f32.mrf.mxu2 }
  0xfa   : > { %v795_v9 = vadd.f32 %v794_v8, %v625_v7 }
  0xfb   : > { %955 = vrot.lane.b32.xlu1 %v954_v18, %s2753_s28  ;;  %1079 = vrot.lane.b32.xlu2 %v954_v18, %s2752_s12 }
  0xfc   : > { %924 = vrot.lane.b32.xlu0 %v923_v19, %s2753_s28  ;;  %v800_v10 = vpack.c.bf16 %v795_v9, %v795_v9 }
  0xfe   : > { %v886_v11 = vsel %vm884_vm2, %v800_v10, 0  ;;  %v1005_v12 = vunpack.c.l.b16 %v800_v10 }
 0x100   : > { %895 = vmatpush.bf16.msra.mxu3 %v886_v11  ;;  %v3067_v13 = vpack.c.b16 %v1005_v12, %v1005_v12 }
 0x101   : > { %v796_v14 = vpop.f32.mrf.mxu2 }
 0x102   : > { %v797_v15 = vadd.f32 %v796_v14, %v625_v7 }
 0x103   : > { %951 = vrot.lane.b32.xlu1 %v950_v27, %s2753_s28  ;;  %1174 = vrot.lane.b32.xlu2 %v927_v4, %s2754_s29 }
 0x104   : > { %1054 = vrot.lane.b32.xlu0 %v923_v19, %s2752_s12  ;;  %v802_v16 = vpack.c.bf16 %v797_v15, %v797_v15 }
 0x106   : > { %v905_v17 = vsel %vm884_vm2, %v802_v16, 0 }
 0x107   : > { %2151 = vmatmul.msk.bf16.vlgmr.msrb.gmra.mxu3 %vm807_vm0, %v801_v5  ;;  %914 = vmatpush.bf16.msrb.mxu0 %v905_v17 }
 0x10b   : > { %1077 = vrot.lane.b32.xlu1 %v950_v27, %s2752_s12  ;;  %1195 = vrot.lane.b32.xlu2 %v950_v27, %s2754_s29 }
 0x10c   : > { %1197 = vrot.lane.b32.xlu0 %v954_v18, %s2754_s29 }
 0x113   : > { %1172 = vrot.lane.b32.xlu1 %v923_v19, %s2754_s29 }
 0x14d   : > { %v1057_v38 = vpop.permute.xlu2 %1056 }
 0x14e   : > { %v1062_v39 = vsel %vm807_vm0, %v1057_v38, 0 }
 0x14f   : > { %1071 = vmatpush.bf16.xpose.msrb.mxu1 %v1062_v39 }
 0x155   : > { %v1080_v40 = vpop.permute.xlu2 %1079 }
 0x156   : > { %v1085_v48 = vsel %vm807_vm0, %v1080_v40, 0 }
 0x15d   : > { %v1175_v41 = vpop.permute.xlu2 %1174 }
 0x15e   : > { %v1180_v42 = vsel %vm807_vm0, %v1175_v41, 0 }
 0x15f   : > { %1189 = vmatpush.bf16.xpose.msra.mxu1 %v1180_v42 }
 0x165   : > { %v929_v43 = vpop.permute.xlu0 %928  ;;  %v1196_v6 = vpop.permute.xlu2 %1195 }
 0x166   : > { %v934_v44 = vsel %vm807_vm0, %v929_v43, 0 }
 0x167   : > { %943 = vmatpush.bf16.xpose.msrb.mxu2 %v934_v44 }
 0x16d   : > { %v956_v45 = vpop.permute.xlu1 %955 }
 0x16e   : > { %v961_v46 = vsel %vm807_vm0, %v956_v45, 0  ;;  %v925_v47 = vpop.permute.xlu0 %924  ;;  %v1029_v45 = vunpack.c.l.b16 %v802_v16 }
 0x16f   : > { %2154 = vmatmul.msk.bf16.vlgmr.msrb.gmra.mxu2 %vm807_vm0, %v925_v47 }
 0x170   : > { %970 = vmatpush.bf16.xpose.msra.mxu2 %v961_v46 }
 0x175   : > { %v952_v51 = vpop.permute.xlu1 %951 }
 0x176   : > { %v1055_v52 = vpop.permute.xlu0 %1054 }
 0x177   : > { %2158 = vmatmul.msk.bf16.vlgmr.msrb.gmra.mxu1 %vm807_vm0, %v1055_v52 }
 0x178   : > { %1094 = vmatpush.bf16.xpose.msrb.mxu2 %v1085_v48 }
 0x17a   : > { %v823_v55 = vpop.f32.mrf.mxu3 }
 0x17b   : > { %v846_v56 = vmul.f32 0.17677669, %v823_v55 }
 0x17d   : > { %v1078_v57 = vpop.permute.xlu1 %1077  ;;  %v854_v58 = vadd.f32 %v3049_v54, %v846_v56 }
 0x17e   : > { %v1198_v59 = vpop.permute.xlu0 %1197 }
 0x17f   : > { %v1203_v60 = vsel %vm807_vm0, %v1198_v59, 0  ;;  %2155 = vmatmul.msk.bf16.vlgmr.msra.gmra.mxu2 %vm807_vm0, %v952_v51  ;;  %v857_v61 = vsel %vm856_vm1, %v854_v58, -inf  ;;  %v3081_v51 = vpack.c.b16 %v1029_v45, %v1029_v45 }
 0x180   : > { %1212 = vmatpush.bf16.xpose.msra.mxu2 %v1203_v60  ;;  %858 = vmax.xlane.f32.xlu0 %v857_v61 }
 0x182   : > { %v825_v62 = vpop.f32.mrf.mxu3 }
 0x185   : > { %v1173_v63 = vpop.permute.xlu1 %1172 }
 0x187   : > { %2162 = vmatmul.msk.bf16.vlgmr.msra.gmra.mxu1 %vm807_vm0, %v1173_v63 }
 0x18a   : > { %v842_v1 = vpop.f32.mrf.mxu3 }
 0x18b   : > { %v847_v2 = vmul.f32 0.17677669, %v842_v1 }
 0x18d   : > { %v855_v3 = vadd.f32 %v3059_v0, %v847_v2 }
 0x18f   : > { %2159 = vmatmul.msk.bf16.vlgmr.msrb.gmra.mxu2 %vm807_vm0, %v1078_v57  ;;  %v860_v4 = vsel %vm856_vm1, %v855_v3, -inf }
 0x190   : > { %861 = vmax.xlane.f32.xlu1 %v860_v4 }
 0x192   : > { %v844_v5 = vpop.f32.mrf.mxu3 }
 0x19f   : > { %2163 = vmatmul.msk.bf16.vlgmr.msra.gmra.mxu2 %vm807_vm0, %v1196_v6 }
 0x1a9   : > { %1128 = vrot.lane.b32.xlu1 %v3067_v13, %s2752_s12 }
 0x1f2   : > { %v945_v53 = vpop.f32.mrf.mxu2 }
 0x1f3   : > { %v976_v18 = vmul.f32 0.17677669, %v945_v53  ;;  %v859_v19 = vpop.xlane.xlu0 %858 }
 0x1f4   : > { %v1073_v20 = vpop.f32.mrf.mxu1  ;;  %v863_v21 = vsub.f32 %v854_v58, %v859_v19 }
 0x1f5   : > { %v1100_v22 = vmul.f32 0.17677669, %v1073_v20  ;;  %v978_v23 = vadd.f32 %v3049_v54, %v976_v18 }
 0x1f6   : > { %v865_v24 = vmul.f32 1.442695, %v863_v21 }
 0x1f7   : > { %v980_v25 = vsel %vm856_vm1, %v978_v23, -inf  ;;  %v1102_v26 = vadd.f32 %v3049_v54, %v1100_v22 }
 0x1f8   : > { %2492 = vpow2.f32 %v865_v24  ;;  %981 = vmax.xlane.f32.xlu2 %v980_v25 }
 0x1f9   : > { %v1104_v27 = vsel %vm856_vm1, %v1102_v26, -inf }
 0x1fa   : > { %v947_v28 = vpop.f32.mrf.mxu2  ;;  %1105 = vmax.xlane.f32.xlu0 %v1104_v27 }
 0x1fc   : > { %v1075_v29 = vpop.f32.mrf.mxu1 }
 0x1fe   : > { %v2493_v30 = vpop.eup %2492 }
 0x1ff   : > { %v869_v31 = vsel %vm856_vm1, %v2493_v30, 0.0 }
 0x202   : > { %v972_v32 = vpop.f32.mrf.mxu2  ;;  %870 = vadd.xlane.f32.xlu0 %v869_v31 }
 0x203   : > { %v977_v33 = vmul.f32 0.17677669, %v972_v32  ;;  %v862_v34 = vpop.xlane.xlu1 %861 }
 0x204   : > { %v1191_v35 = vpop.f32.mrf.mxu1  ;;  %v864_v37 = vsub.f32 %v855_v3, %v862_v34 }
 0x205   : > { %v979_v36 = vadd.f32 %v3059_v0, %v977_v33  ;;  %v1218_v38 = vmul.f32 0.17677669, %v1191_v35 }
 0x206   : > { %v867_v40 = vmul.f32 1.442695, %v864_v37 }
 0x207   : > { %v983_v39 = vsel %vm856_vm1, %v979_v36, -inf  ;;  %v1220_v42 = vadd.f32 %v3049_v54, %v1218_v38 }
 0x208   : > { %984 = vmax.xlane.f32.xlu2 %v983_v39  ;;  %2494 = vpow2.f32 %v867_v40 }
 0x209   : > { %v1222_v44 = vsel %vm856_vm1, %v1220_v42, -inf }
 0x20a   : > { %v974_v41 = vpop.f32.mrf.mxu2 }
 0x20c   : > { %v1193_v43 = vpop.f32.mrf.mxu1 }
 0x20e   : > { %v2495_v48 = vpop.eup %2494 }
 0x20f   : > { %v872_v54 = vsel %vm856_vm1, %v2495_v48, 0.0 }
 0x210   : > { %1223 = vmax.xlane.f32.xlu2 %v1222_v44 }
 0x212   : > { %v1096_v46 = vpop.f32.mrf.mxu2 }
 0x213   : > { %v1101_v47 = vmul.f32 0.17677669, %v1096_v46 }
 0x215   : > { %v1103_v52 = vadd.f32 %v3059_v0, %v1101_v47 }
 0x216   : > { %1031 = vrot.lane.b32.xlu0 %v3081_v51, %s2753_s28 }
 0x217   : > { %v1107_v55 = vsel %vm856_vm1, %v1103_v52, -inf }
 0x218   : > { %1108 = vmax.xlane.f32.xlu1 %v1107_v55  ;;  %873 = vadd.xlane.f32.xlu2 %v872_v54 }
 0x21a   : > { %v1098_v56 = vpop.f32.mrf.mxu2 }
 0x21b   : > { %v1129_v16 = vpop.permute.xlu1 %1128 }
 0x21c   : > { %v1134_v33 = vsel %vm884_vm2, %v1129_v16, 0 }
 0x222   : > { %v1214_v57 = vpop.f32.mrf.mxu2 }
 0x223   : > { %v1219_v58 = vmul.f32 0.17677669, %v1214_v57 }
 0x225   : > { %v3089_v59 = vadd.f32 %v3059_v0, %v1219_v58 }
 0x227   : > { %v1225_v60 = vsel %vm856_vm1, %v3089_v59, -inf }
 0x228   : > { %1226 = vmax.xlane.f32.xlu1 %v1225_v60 }
 0x22a   : > { %v1216_v61 = vpop.f32.mrf.mxu2 }
 0x230   : > { %1007 = vrot.lane.b32.xlu2 %v3067_v13, %s2753_s28 }
 0x26b   : > { %v982_v62 = vpop.xlane.xlu2 %981 }
 0x26c   : > { %v986_v63 = vsub.f32 %v978_v23, %v982_v62 }
 0x26d   : > { %v1106_v1 = vpop.xlane.xlu0 %1105 }
 0x26e   : > { %v988_v2 = vmul.f32 1.442695, %v986_v63  ;;  %v1110_v3 = vsub.f32 %v1102_v26, %v1106_v1 }
 0x270   : > { %2496 = vpow2.f32 %v988_v2  ;;  %v1112_v4 = vmul.f32 1.442695, %v1110_v3 }
 0x272   : > { %2498 = vpow2.f32 %v1112_v4 }
 0x275   : > { %v871_v5 = vpop.xlane.xlu0 %870 }
 0x276   : > { %v2497_v6 = vpop.eup %2496  ;;  %2500 = vrcp.f32 %v871_v5 }
 0x277   : > { %v992_v0 = vsel %vm856_vm1, %v2497_v6, 0.0 }
 0x278   : > { %v3096_v7 = vpop.eup %2498  ;;  %993 = vadd.xlane.f32.xlu0 %v992_v0 }
 0x279   : > { %v1116_v8 = vsel %vm856_vm1, %v3096_v7, 0.0 }
 0x27a   : > { %1117 = vadd.xlane.f32.xlu1 %v1116_v8 }
 0x27b   : > { %v985_v9 = vpop.xlane.xlu2 %984 }
 0x27c   : > { %v2501_v10 = vpop.eup %2500  ;;  %v987_v11 = vsub.f32 %v979_v36, %v985_v9 }
 0x27d   : > { %v877_v12 = vmul.f32 %v2501_v10, %v2493_v30 }
 0x27e   : > { %v990_v14 = vmul.f32 1.442695, %v987_v11 }
 0x27f   : > { %v879_v15 = vpack.c.bf16 %v877_v12, %v877_v12 }
 0x280   : > { %2502 = vpow2.f32 %v990_v14 }
 0x281   : > { %2152 = vmatmul.msk.bf16.vlgmr.msra.gmra.mxu3 %vm856_vm1, %v879_v15 }
 0x283   : > { %v1224_v17 = vpop.xlane.xlu2 %1223 }
 0x284   : > { %v1228_v53 = vsub.f32 %v1220_v42, %v1224_v17 }
 0x286   : > { %v2503_v18 = vpop.eup %2502  ;;  %v1230_v19 = vmul.f32 1.442695, %v1228_v53 }
 0x287   : > { %v995_v20 = vsel %vm856_vm1, %v2503_v18, 0.0 }
 0x288   : > { %2504 = vpow2.f32 %v1230_v19  ;;  %v1032_v21 = vpop.permute.xlu0 %1031  ;;  %996 = vadd.xlane.f32.xlu1 %v995_v20 }
 0x289   : > { %v1037_v22 = vsel %vm884_vm2, %v1032_v21, 0 }
 0x28a   : > { %1046 = vmatpush.bf16.msra.mxu0 %v1037_v22 }
 0x28b   : > { %v874_v23 = vpop.xlane.xlu2 %873  ;;  %v1109_v24 = vpop.xlane.xlu1 %1108 }
 0x28c   : > { %2506 = vrcp.f32 %v874_v23  ;;  %v1111_v25 = vsub.f32 %v1103_v52, %v1109_v24  ;;  %1149 = vrot.lane.b32.xlu0 %v3081_v51, %s2752_s12 }
 0x28e   : > { %v2505_v26 = vpop.eup %2504  ;;  %v1114_v27 = vmul.f32 1.442695, %v1111_v25 }
 0x28f   : > { %v1234_v28 = vsel %vm856_vm1, %v2505_v26, 0.0 }
 0x290   : > { %2508 = vpow2.f32 %v1114_v27  ;;  %1235 = vadd.xlane.f32.xlu2 %v1234_v28 }
 0x292   : > { %v2507_v29 = vpop.eup %2506 }
 0x293   : > { %v878_v30 = vmul.f32 %v2507_v29, %v2495_v48  ;;  %v1008_v31 = vpop.permute.xlu2 %1007 }
 0x294   : > { %v1013_v32 = vsel %vm884_vm2, %v1008_v31, 0 }
 0x295   : > { %1022 = vmatpush.bf16.msrb.mxu3 %v1013_v32  ;;  %v880_v34 = vpack.c.bf16 %v878_v30, %v878_v30 }
 0x296   : > { %v2509_v35 = vpop.eup %2508 }
 0x297   : > { %2153 = vmatmul.msk.bf16.vlgmr.msrb.gmra.mxu0 %vm856_vm1, %v880_v34  ;;  %v1119_v36 = vsel %vm856_vm1, %v2509_v35, 0.0 }
 0x298   : > { %1120 = vadd.xlane.f32.xlu1 %v1119_v36 }
 0x299   : > { %1143 = vmatpush.bf16.msra.mxu3 %v1134_v33 }
 0x29b   : > { %v1227_v37 = vpop.xlane.xlu1 %1226 }
 0x29c   : > { %v1229_v38 = vsub.f32 %v3089_v59, %v1227_v37 }
 0x29e   : > { %v1232_v39 = vmul.f32 1.442695, %v1229_v38 }
 0x2a0   : > { %2510 = vpow2.f32 %v1232_v39 }
 0x2a6   : > { %v2511_v40 = vpop.eup %2510 }
 0x2a7   : > { %v1237_v41 = vsel %vm856_vm1, %v2511_v40, 0.0 }
 0x2b1   : > { %1246 = vrot.lane.b32.xlu1 %v3067_v13, %s2754_s29 }
 0x2b6   : > { %1238 = vadd.xlane.f32.xlu0 %v1237_v41 }
 0x2b9   : > { %1267 = vrot.lane.b32.xlu1 %v3081_v51, %s2754_s29 }
 0x2eb   : > { %v994_v42 = vpop.xlane.xlu0 %993 }
 0x2ec   : > { %2512 = vrcp.f32 %v994_v42 }
 0x2ed   : > { %v1118_v45 = vpop.xlane.xlu1 %1117 }
 0x2ee   : > { %2514 = vrcp.f32 %v1118_v45  ;;  %v2363_v45 = vld [vmem:[%s2921_s30 + $0x30] sm:$0xff] }
 0x2f2   : > { %v2513_v43 = vpop.eup %2512 }
 0x2f3   : > { %v1000_v44 = vmul.f32 %v2513_v43, %v2497_v6 }
 0x2f4   : > { %v2515_v48 = vpop.eup %2514 }
 0x2f5   : > { %v1002_v46 = vpack.c.bf16 %v1000_v44, %v1000_v44  ;;  %v1124_v55 = vmul.f32 %v2515_v48, %v3096_v7  ;;  %v2364_v44 = vld [vmem:[%s2921_s30 + $0x38] sm:$0xff] }
 0x2f6   : > { %1407 = vmatpush.bf16.msrb.mxu1 %v2364_v44  ;;  %v2360_v48 = vld [vmem:[%s2921_s30 + $0x18] sm:$0xff]  ;;  %v2224_v44 = vld [vmem:[%s2927_s25 + $0x30] sm:$0xf] }
 0x2f7   : > { %2156 = vmatmul.msk.bf16.vlgmr.msrb.gmra.mxu3 %vm856_vm1, %v1002_v46  ;;  %v1126_v57 = vpack.c.bf16 %v1124_v55, %v1124_v55  ;;  %v2362_v46 = vld [vmem:[%s2921_s30 + $0x28] sm:$0xff]  ;;  %v2357_v55 = vld [vmem:[%s2921_s30] sm:$0xff] }
 0x2fa   : > { %1408 = vmatpush.bf16.msrb.mxu1 %v2363_v45  ;;  %v2372_v45 = vld [vmem:[%s2927_s25 + $0x34] sm:$0xf0] }
 0x2fb   : > { %v997_v47 = vpop.xlane.xlu1 %996 }
 0x2fc   : > { %2516 = vrcp.f32 %v997_v47  ;;  %v2361_v47 = vld [vmem:[%s2921_s30 + $0x20] sm:$0xff] }
 0x2fe   : > { %v1150_v13 = vpop.permute.xlu0 %1149  ;;  %1409 = vmatpush.bf16.msrb.mxu1 %v2362_v46  ;;  %v2371_v46 = vld [vmem:[%s2927_s25 + $0x34] sm:$0xf] }
 0x2ff   : > { %v1155_v52 = vsel %vm884_vm2, %v1150_v13, 0  ;;  %v2359_v13 = vld [vmem:[%s2921_s30 + $0x10] sm:$0xff] }
 0x300   : > { %1164 = vmatpush.bf16.msrb.mxu0 %v1155_v52  ;;  %v2358_v52 = vld [vmem:[%s2921_s30 + $0x8] sm:$0xff]  ;;  %s2756_s30 = smov [#allocation10]  }
 0x302   : > { %v2517_v54 = vpop.eup %2516  ;;  %1410 = vmatpush.bf16.msrb.mxu1 %v2361_v47 }
 0x303   : > { %v1001_v51 = vmul.f32 %v2517_v54, %v2503_v18  ;;  %v1236_v2 = vpop.xlane.xlu2 %1235 }
 0x304   : > { %v3119_v56 = vpop.f32.mrf.mxu3 }
 0x305   : > { %v1003_v58 = vpack.c.bf16 %v1001_v51, %v1001_v51 }
 0x306   : > { %1411 = vmatpush.bf16.msrb.mxu1 %v2360_v48  ;;  %v2225_v48 = vor.u32 %v2372_v45, %v2224_v44 }
 0x307   : > { %2157 = vmatmul.msk.bf16.vlgmr.msra.gmra.mxu0 %vm856_vm1, %v1003_v58  ;;  %2160 = vmatmul.msk.bf16.vlgmr.msra.gmra.mxu3 %vm856_vm1, %v1126_v57  ;;  %v920_v58 = vpack.c.bf16 %v3119_v56, %v3119_v56 }
 0x30a   : > { %1412 = vmatpush.bf16.msrb.mxu1 %v2359_v13  ;;  %v2226_v13 = vld [vmem:[%s2927_s25 + $0x38] sm:$0xf0] }
 0x30b   : > { %v1121_v59 = vpop.xlane.xlu1 %1120 }
 0x30c   : > { %2518 = vrcp.f32 %v1121_v59  ;;  %v899_v60 = vpop.f32.mrf.mxu3 }
 0x30d   : > { %2520 = vrcp.f32 %v1236_v2 }
 0x30e   : > { %1413 = vmatpush.bf16.msrb.mxu1 %v2358_v52  ;;  %v2229_v52 = vor.u32 %v2371_v46, %v2226_v13 }
 0x312   : > { %v2519_v61 = vpop.eup %2518  ;;  %1414 = vmatpush.bf16.msrb.mxu1 %v2357_v55  ;;  %v2216_v55 = vld [vmem:[%s2927_s25 + $0x20] sm:$0xf] }
 0x313   : > { %v1125_v62 = vmul.f32 %v2519_v61, %v2509_v35  ;;  %v2521_v4 = vpop.eup %2520 }
 0x314   : > { %v3123_v63 = vpop.f32.mrf.mxu0  ;;  %v1242_v5 = vmul.f32 %v2521_v4, %v2505_v26 }
 0x315   : > { %v1127_v1 = vpack.c.bf16 %v1125_v62, %v1125_v62  ;;  %v921_v60 = vpack.c.bf16 %v3123_v63, %v3123_v63 }
 0x316   : > { %v1244_v7 = vpack.c.bf16 %v1242_v5, %v1242_v5 }
 0x317   : > { %2161 = vmatmul.msk.bf16.vlgmr.msrb.gmra.mxu0 %vm856_vm1, %v1127_v1 }
 0x31c   : > { %v918_v3 = vpop.f32.mrf.mxu0 }
 0x323   : > { %v1247_v6 = vpop.permute.xlu1 %1246 }
 0x324   : > { %v1252_v0 = vsel %vm884_vm2, %v1247_v6, 0 }
 0x325   : > { %1261 = vmatpush.bf16.msrb.mxu3 %v1252_v0 }
 0x328   : > { %2164 = vmatmul.msk.bf16.vlgmr.msrb.gmra.mxu3 %vm856_vm1, %v1244_v7 }
 0x329   : > { %v1239_v8 = vpop.xlane.xlu0 %1238 }
 0x32a   : > { %2522 = vrcp.f32 %v1239_v8  ;;  %v3151_v8 = vld [vmem:[%s2950_s0] sm:$0x3f] }
 0x32b   : > { %v1268_v9 = vpop.permute.xlu1 %1267  ;;  %v1474_v45 = vperm.slane %v3151_v8, 1 }
 0x32c   : > { %v1273_v10 = vsel %vm884_vm2, %v1268_v9, 0  ;;  %v1352_v9 = vperm.slane %v3151_v8, 0 }
 0x32d   : > { %1282 = vmatpush.bf16.msra.mxu0 %v1273_v10 }
 0x330   : > { %v2523_v11 = vpop.eup %2522 }
 0x331   : > { %v1243_v12 = vmul.f32 %v2523_v11, %v2511_v40 }
 0x333   : > { %v1245_v14 = vpack.c.bf16 %v1243_v12, %v1243_v12 }
 0x335   : > { %2165 = vmatmul.msk.bf16.vlgmr.msra.gmra.mxu0 %vm856_vm1, %v1245_v14 }
 0x37a   : > { %v1024_v15 = vpop.f32.mrf.mxu3 }
 0x37b   : > { %v1052_v16 = vpack.c.bf16 %v1024_v15, %v1024_v15 }
 0x37d   : > { %v1292_v17 = vunpack.c.l.b16 %v1052_v16 }
 0x37f   : > { %v1294_v53 = vpack.c.b16 %v1292_v17, %v1292_v17  ;;  %v2755_v17 = vmov 128.0  }
 0x380   : > { %2524 = vrcp.f32 %v2755_v17 }
 0x381   : > { %1296 = vrot.lane.b32.xlu1 %v1294_v53, %s2754_s29  ;;  %v2256_v53 = vld [vmem:[%s2927_s25 + $0x70] sm:$0xf] }
 0x382   : > { %v1026_v18 = vpop.f32.mrf.mxu3 }
 0x383   : > { %v2380_v18 = vld [vmem:[%s2927_s25 + $0x74] sm:$0xf0] }
 0x384   : > { %v1048_v19 = vpop.f32.mrf.mxu0 }
 0x385   : > { %v1053_v20 = vpack.c.bf16 %v1048_v19, %v1048_v19  ;;  %v2379_v19 = vld [vmem:[%s2927_s25 + $0x74] sm:$0xf] }
 0x387   : > { %v1293_v21 = vunpack.c.l.b16 %v1053_v20  ;;  %v2257_v20 = vor.u32 %v2380_v18, %v2256_v53 }
 0x389   : > { %v1295_v22 = vpack.c.b16 %v1293_v21, %v1293_v21  ;;  %v2258_v21 = vld [vmem:[%s2927_s25 + $0x78] sm:$0xf0]  ;;  %1583 = vmatpush.bf16.msrb.mxu2 %v2257_v20 }
 0x38a   : > { %v1145_v23 = vpop.f32.mrf.mxu3 }
 0x38b   : > { %v1170_v24 = vpack.c.bf16 %v1145_v23, %v1145_v23  ;;  %1298 = vrot.lane.b32.xlu2 %v1295_v22, %s2754_s29  ;;  %v2261_v22 = vor.u32 %v2379_v19, %v2258_v21  ;;  %v2248_v23 = vld [vmem:[%s2927_s25 + $0x60] sm:$0xf] }
 0x38c   : > { %v1050_v25 = vpop.f32.mrf.mxu0 }
 0x38d   : > { %v1302_v26 = vunpack.c.l.b16 %v1170_v24  ;;  %1597 = vmatpush.bf16.msra.mxu3 %v2261_v22  ;;  %v2378_v24 = vld [vmem:[%s2927_s25 + $0x64] sm:$0xf0]  ;;  %v2377_v25 = vld [vmem:[%s2927_s25 + $0x64] sm:$0xf]  ;;  %v2396_v22 = vld [vmem:[%s2929_s23 + $0x78] sm:$0xff] }
 0x38e   : > { %1760 = vmatpush.bf16.msra.mxu1 %v2396_v22 }
 0x38f   : > { %v1304_v27 = vpack.c.b16 %v1302_v26, %v1302_v26 }
 0x391   : > { %1306 = vrot.lane.b32.xlu1 %v1304_v27, %s2752_s12  ;;  %v2249_v27 = vor.u32 %v2378_v24, %v2248_v23  ;;  %v2387_v24 = vld [vmem:[%s2929_s23 + $0x30] sm:$0xff] }
 0x392   : > { %v1147_v28 = vpop.f32.mrf.mxu3 }
 0x393   : > { %v2250_v28 = vld [vmem:[%s2927_s25 + $0x68] sm:$0xf0]  ;;  %1584 = vmatpush.bf16.msrb.mxu2 %v2249_v27 }
 0x394   : > { %v1166_v29 = vpop.f32.mrf.mxu0 }
 0x395   : > { %v1171_v30 = vpack.c.bf16 %v1166_v29, %v1166_v29  ;;  %v2253_v29 = vor.u32 %v2377_v25, %v2250_v28  ;;  %v2395_v25 = vld [vmem:[%s2929_s23 + $0x70] sm:$0xff] }
 0x396   : > { %1761 = vmatpush.bf16.msra.mxu1 %v2395_v25 }
 0x397   : > { %v1303_v31 = vunpack.c.l.b16 %v1171_v30  ;;  %1598 = vmatpush.bf16.msra.mxu3 %v2253_v29  ;;  %v2240_v30 = vld [vmem:[%s2927_s25 + $0x50] sm:$0xf]  ;;  %v2386_v29 = vld [vmem:[%s2929_s23 + $0x28] sm:$0xff] }
 0x399   : > { %v1305_v32 = vpack.c.b16 %v1303_v31, %v1303_v31  ;;  %v2376_v31 = vld [vmem:[%s2927_s25 + $0x54] sm:$0xf0] }
 0x39b   : > { %1308 = vrot.lane.b32.xlu0 %v1305_v32, %s2752_s12  ;;  %v2375_v32 = vld [vmem:[%s2927_s25 + $0x54] sm:$0xf] }
 0x39c   : > { %v1168_v33 = vpop.f32.mrf.mxu0 }
 0x3ab   : > { %v1263_v34 = vpop.f32.mrf.mxu3 }
 0x3ac   : > { %v1288_v35 = vpack.c.bf16 %v1263_v34, %v1263_v34  ;;  %v2241_v34 = vor.u32 %v2376_v31, %v2240_v30  ;;  %v2394_v30 = vld [vmem:[%s2929_s23 + $0x68] sm:$0xff] }
 0x3ad   : > { %1762 = vmatpush.bf16.msra.mxu1 %v2394_v30 }
 0x3ae   : > { %v1312_v36 = vunpack.c.l.b16 %v1288_v35  ;;  %v2242_v35 = vld [vmem:[%s2927_s25 + $0x58] sm:$0xf0]  ;;  %1585 = vmatpush.bf16.msrb.mxu2 %v2241_v34  ;;  %v2393_v34 = vld [vmem:[%s2929_s23 + $0x60] sm:$0xff] }
 0x3b0   : > { %v1314_v37 = vpack.c.b16 %v1312_v36, %v1312_v36  ;;  %v2245_v36 = vor.u32 %v2375_v32, %v2242_v35 }
 0x3b1   : > { %1763 = vmatpush.bf16.msra.mxu1 %v2393_v34 }
 0x3b2   : > { %v1284_v38 = vpop.f32.mrf.mxu0  ;;  %1316 = vrot.lane.b32.xlu1 %v1314_v37, %s2753_s28  ;;  %1599 = vmatpush.bf16.msra.mxu3 %v2245_v36  ;;  %v2232_v37 = vld [vmem:[%s2927_s25 + $0x40] sm:$0xf] }
 0x3b3   : > { %v1289_v39 = vpack.c.bf16 %v1284_v38, %v1284_v38  ;;  %v1265_v40 = vpop.f32.mrf.mxu3  ;;  %v2374_v38 = vld [vmem:[%s2927_s25 + $0x44] sm:$0xf0] }
 0x3b5   : > { %v1313_v41 = vunpack.c.l.b16 %v1289_v39  ;;  %v2373_v39 = vld [vmem:[%s2927_s25 + $0x44] sm:$0xf] }
 0x3b7   : > { %v1315_v42 = vpack.c.b16 %v1313_v41, %v1313_v41  ;;  %v2233_v41 = vor.u32 %v2374_v38, %v2232_v37 }
 0x3b9   : > { %1586 = vmatpush.bf16.msrb.mxu2 %v2233_v41 }
 0x3ba   : > { %v1286_v43 = vpop.f32.mrf.mxu0  ;;  %1318 = vrot.lane.b32.xlu1 %v1315_v42, %s2753_s28  ;;  %v2234_v42 = vld [vmem:[%s2927_s25 + $0x48] sm:$0xf0] }
 0x3bb   : > { %v2237_v43 = vor.u32 %v2373_v39, %v2234_v42 }
 0x3bd   : > { %1600 = vmatpush.bf16.msra.mxu3 %v2237_v43  ;;  %1587 = vmatpush.bf16.msrb.mxu2 %v2225_v48 }
 0x3c1   : > { %1601 = vmatpush.bf16.msra.mxu3 %v2229_v52 }
 0x3e5   : > { %v1299_v59 = vpop.permute.xlu2 %1298 }
 0x3e6   : > { %v1325_v2 = vsel %vm807_vm0, %v921_v60, %v1299_v59  ;;  %v2218_v59 = vld [vmem:[%s2927_s25 + $0x28] sm:$0xf0] }
 0x3f3   : > { %v1297_v54 = vpop.permute.xlu1 %1296 }
 0x3f4   : > { %v1322_v61 = vsel %vm807_vm0, %v920_v58, %v1297_v54  ;;  %v2370_v54 = vld [vmem:[%s2927_s25 + $0x24] sm:$0xf0] }
 0x3f5   : > { %v2217_v58 = vor.u32 %v2370_v54, %v2216_v55 }
 0x3f7   : > { %1588 = vmatpush.bf16.msrb.mxu2 %v2217_v58 }
 0x403   : > { %v1307_v51 = vpop.permute.xlu1 %1306 }
 0x404   : > { %v1328_v1 = vsel %vm1326_vm3, %v1322_v61, %v1307_v51  ;;  %v2369_v51 = vld [vmem:[%s2927_s25 + $0x24] sm:$0xf] }
 0x405   : > { %v2221_v60 = vor.u32 %v2369_v51, %v2218_v59  ;;  %v2384_v59 = vld [vmem:[%s2929_s23 + $0x18] sm:$0xff] }
 0x407   : > { %1602 = vmatpush.bf16.msra.mxu3 %v2221_v60  ;;  %v2383_v60 = vld [vmem:[%s2929_s23 + $0x10] sm:$0xff] }
 0x40d   : > { %v1309_v62 = vpop.permute.xlu0 %1308 }
 0x40e   : > { %v1330_v4 = vsel %vm1326_vm3, %v1325_v2, %v1309_v62  ;;  %v2368_v2 = vld [vmem:[%s2927_s25 + $0x14] sm:$0xf0] }
 0x424   : > { %v1317_v57 = vpop.permute.xlu1 %1316 }
 0x425   : > { %v1333_v3 = vsel %vm1331_vm4, %v1328_v1, %v1317_v57  ;;  %v2208_v1 = vld [vmem:[%s2927_s25 + $0x10] sm:$0xf] }
 0x426   : > { %v1355_v0 = vunpack.c.l.b16 %v1333_v3  ;;  %v2367_v3 = vld [vmem:[%s2927_s25 + $0x14] sm:$0xf] }
 0x42c   : > { %v1319_v5 = vpop.permute.xlu1 %1318 }
 0x42d   : > { %v1335_v6 = vsel %vm1331_vm4, %v1330_v4, %v1319_v5  ;;  %v2209_v5 = vor.u32 %v2368_v2, %v2208_v1  ;;  %v2390_v1 = vld [vmem:[%s2929_s23 + $0x48] sm:$0xff]  ;;  %v2381_v2 = vld [vmem:[%s2929_s23] sm:$0xff] }
 0x42e   : > { %v1356_v7 = vunpack.c.l.b16 %v1335_v6  ;;  %v2210_v6 = vld [vmem:[%s2927_s25 + $0x18] sm:$0xf0] }
 0x42f   : > { %1589 = vmatpush.bf16.msrb.mxu2 %v2209_v5 }
 0x430   : > { %v1357_v56 = vpack.c.b16 %v1356_v7, %v1355_v0 }
 0x432   : > { %1415 = vmatmul.bf16.vlgmr.msrb.gmra.mxu1 %v1357_v56  ;;  %v2213_v56 = vor.u32 %v2367_v3, %v2210_v6  ;;  %v2389_v3 = vld [vmem:[%s2929_s23 + $0x40] sm:$0xff] }
 0x434   : > { %1603 = vmatpush.bf16.msra.mxu3 %v2213_v56 }
 0x4af   : > { %v1416_v63 = vpop.f32.mrf.mxu1 }
 0x4b0   : > { %v1417_v10 = vadd.f32 %v1416_v63, %v1352_v9  ;;  %v2366_v63 = vld [vmem:[%s2927_s25 + $0x4] sm:$0xf0] }
 0x4b2   : > { %v3155_v11 = vadd.f32 %v1417_v10, %v2991_v49  ;;  %v2365_v10 = vld [vmem:[%s2927_s25 + $0x4] sm:$0xf] }
 0x4b4   : > { %1423 = vadd.xlane.f32.xlu2 %v3155_v11  ;;  %v1436_v12 = vmul.f32 %v3155_v11, %v3155_v11 }
 0x4b6   : > { %1438 = vadd.xlane.f32.xlu0 %v1436_v12 }
 0x4b7   : > { %v1418_v14 = vpop.f32.mrf.mxu1 }
 0x4b8   : > { %v1419_v15 = vadd.f32 %v1418_v14, %v1352_v9  ;;  %v2200_v9 = vld [vmem:[%s2927_s25] sm:$0xf]  ;;  %v2202_v14 = vld [vmem:[%s2927_s25 + $0x8] sm:$0xf0]  ;;  %s1836_s25 = sshll.u32 %s2756_s30, 4  ;;  %s1837_s25 = int_to_ptr.vmem [resolvable:$true] %s1836_s25 }
 0x4b9   : > { %v2201_v12 = vor.u32 %v2366_v63, %v2200_v9 }
 0x4ba   : > { %v3161_v16 = vadd.f32 %v1419_v15, %v2993_v50  ;;  %v2525_v50 = vpop.eup %2524 }
 0x4bb   : > { %v1428_v26 = vmul.f32 128.0, %v2525_v50  ;;  %vm1432_vm5 = vweird.f32 %v2525_v50  ;;  %1590 = vmatpush.bf16.msrb.mxu2 %v2201_v12 }
 0x4bc   : > { %1425 = vadd.xlane.f32.xlu1 %v3161_v16  ;;  %v1437_v49 = vmul.f32 %v3161_v16, %v3161_v16 }
 0x4bd   : > { %v1429_v33 = vsub.f32 1.0, %v1428_v26 }
 0x4be   : > { %1440 = vadd.xlane.f32.xlu2 %v1437_v49  ;;  %v2205_v49 = vor.u32 %v2365_v10, %v2202_v14 }
 0x4bf   : > { %v1430_v40 = vmul.f32 %v2525_v50, %v1429_v33  ;;  %v2385_v33 = vld [vmem:[%s2929_s23 + $0x20] sm:$0xff] }
 0x4c0   : > { %1604 = vmatpush.bf16.msra.mxu3 %v2205_v49 }
 0x4c1   : > { %v1431_v47 = vadd.f32 %v2525_v50, %v1430_v40 }
 0x4c3   : > { %v3189_v57 = vsel %vm1432_vm5, %v2525_v50, %v1431_v47  ;;  %v2388_v50 = vld [vmem:[%s2929_s23 + $0x38] sm:$0xff] }
 0x4c4   : > { %1746 = vmatpush.bf16.msrb.mxu0 %v2388_v50 }
 0x4c8   : > { %1747 = vmatpush.bf16.msrb.mxu0 %v2387_v24 }
 0x4cc   : > { %1748 = vmatpush.bf16.msrb.mxu0 %v2386_v29 }
 0x4d0   : > { %1749 = vmatpush.bf16.msrb.mxu0 %v2385_v33 }
 0x4d4   : > { %1750 = vmatpush.bf16.msrb.mxu0 %v2384_v59 }
 0x4d8   : > { %1751 = vmatpush.bf16.msrb.mxu0 %v2383_v60  ;;  %v1823_v60 = vperm.slane %v3151_v8, 4 }
 0x527   : > { %v1424_v61 = vpop.xlane.xlu2 %1423 }
 0x528   : > { %v3193_v62 = vmul.f32 %v3189_v57, %v1424_v61  ;;  %v2391_v61 = vld [vmem:[%s2929_s23 + $0x50] sm:$0xff] }
 0x529   : > { %v1439_v4 = vpop.xlane.xlu0 %1438 }
 0x52a   : > { %v1446_v0 = vmul.f32 %v3193_v62, %v3193_v62  ;;  %v1442_v7 = vmul.f32 %v1439_v4, %v3189_v57  ;;  %v1444_v42 = vsub.f32 %v3155_v11, %v3193_v62  ;;  %v1477_v11 = vperm.slane %v3151_v8, 2  ;;  %v2382_v62 = vld [vmem:[%s2929_s23 + $0x8] sm:$0xff]  ;;  %v1497_v4 = vld [vmem:[%s2940_s20] sm:$0x3] }
 0x52b   : > { %1752 = vmatpush.bf16.msrb.mxu0 %v2382_v62 }
 0x52c   : > { %v1448_v15 = vsub.f32 %v1442_v7, %v1446_v0  ;;  %v1499_v0 = vperm.slane %v1497_v4, 0  ;;  %v1500_v7 = vperm.slane %v1497_v4, 1 }
 0x52e   : > { %v1450_v17 = vadd.f32 1e-05, %v1448_v15 }
 0x52f   : > { %v1426_v53 = vpop.xlane.xlu1 %1425  ;;  %1753 = vmatpush.bf16.msrb.mxu0 %v2381_v2 }
 0x530   : > { %2526 = vrsqrt.f32 %v1450_v17  ;;  %v1435_v18 = vmul.f32 %v3189_v57, %v1426_v53  ;;  %vm1458_vm7 = vweird.f32 %v1450_v17 }
 0x531   : > { %v1441_v19 = vpop.xlane.xlu2 %1440 }
 0x532   : > { %v1447_v20 = vmul.f32 %v1435_v18, %v1435_v18  ;;  %v1443_v21 = vmul.f32 %v1441_v19, %v3189_v57  ;;  %v1445_v47 = vsub.f32 %v3161_v16, %v1435_v18  ;;  %v2392_v16 = vld [vmem:[%s2929_s23 + $0x58] sm:$0xff] }
 0x533   : > { %1764 = vmatpush.bf16.msra.mxu1 %v2392_v16 }
 0x534   : > { %v1449_v23 = vsub.f32 %v1443_v21, %v1447_v20  ;;  %v1649_v20 = vperm.slane %v3151_v8, 5 }
 0x536   : > { %v2527_v26 = vpop.eup %2526  ;;  %v1451_v27 = vadd.f32 1e-05, %v1449_v23 }
 0x537   : > { %v1453_v28 = vmul.f32 %v2527_v26, %v1450_v17  ;;  %vm1459_vm6 = vweird.f32 %v2527_v26  ;;  %1765 = vmatpush.bf16.msra.mxu1 %v2391_v61 }
 0x538   : > { %2528 = vrsqrt.f32 %v1451_v27  ;;  %vm1460_vm8 = vmor %vm1458_vm7, %vm1459_vm6  ;;  %vm1468_vm10 = vweird.f32 %v1451_v27 }
 0x539   : > { %v1454_v31 = vmul.f32 %v2527_v26, %v1453_v28 }
 0x53b   : > { %v1455_v32 = vmul.f32 0.5, %v1454_v31  ;;  %1766 = vmatpush.bf16.msra.mxu1 %v2390_v1 }
 0x53d   : > { %v1456_v35 = vsub.f32 1.5, %v1455_v32 }
 0x53e   : > { %v2529_v36 = vpop.eup %2528 }
 0x53f   : > { %v1457_v37 = vmul.f32 %v2527_v26, %v1456_v35  ;;  %v1463_v38 = vmul.f32 %v2529_v36, %v1451_v27  ;;  %vm1469_vm9 = vweird.f32 %v2529_v36  ;;  %1767 = vmatpush.bf16.msra.mxu1 %v2389_v3 }
 0x540   : > { %vm1470_vm11 = vmor %vm1468_vm10, %vm1469_vm9 }
 0x541   : > { %v1464_v39 = vmul.f32 %v2529_v36, %v1463_v38  ;;  %v1461_v40 = vsel %vm1460_vm8, %v2527_v26, %v1457_v37 }
 0x542   : > { %v1472_v44 = vmul.f32 %v1461_v40, %v1444_v42 }
 0x543   : > { %v1465_v41 = vmul.f32 0.5, %v1464_v39 }
 0x544   : > { %v1475_v52 = vmul.f32 %v1474_v45, %v1472_v44 }
 0x545   : > { %v1466_v43 = vsub.f32 1.5, %v1465_v41 }
 0x546   : > { %v1478_v54 = vadd.f32 %v1477_v11, %v1475_v52 }
 0x547   : > { %v1467_v46 = vmul.f32 %v2529_v36, %v1466_v43 }
 0x549   : > { %v1471_v48 = vsel %vm1470_vm11, %v2529_v36, %v1467_v46 }
 0x54a   : > { %v1473_v13 = vmul.f32 %v1471_v48, %v1445_v47 }
 0x54c   : > { %v1476_v55 = vmul.f32 %v1474_v45, %v1473_v13 }
 0x54e   : > { %v1479_v51 = vadd.f32 %v1477_v11, %v1476_v55 }
 0x550   : > { %v1480_v58 = vpack.c.bf16 %v1479_v51, %v1478_v54 }
 0x552   : > { %1591 = vmatmul.bf16.vlgmr.msrb.gmra.mxu2 %v1480_v58  ;;  %1605 = vmatmul.bf16.vlgmr.msra.gmra.mxu3 %v1480_v58  ;;  %v1820_v58 = vperm.slane %v3151_v8, 3 }
 0x5d5   : > { %v1592_v5 = vpop.f32.mrf.mxu2  ;;  %v1606_v6 = vpop.f32.mrf.mxu3 }
 0x5d6   : > { %v1593_v56 = vadd.f32 %v1592_v5, %v1499_v0  ;;  %v1607_v9 = vadd.f32 %v1606_v6, %v1500_v7 }
 0x5d8   : > { %v1611_v15 = vmax.f32 %v1593_v56, 0.0  ;;  %v1612_v49 = vmax.f32 %v1607_v9, 0.0 }
 0x5dd   : > { %v1594_v63 = vpop.f32.mrf.mxu2  ;;  %v1608_v10 = vpop.f32.mrf.mxu3 }
 0x5de   : > { %v1595_v12 = vadd.f32 %v1594_v63, %v1499_v0  ;;  %v1609_v14 = vadd.f32 %v1608_v10, %v1500_v7 }
 0x5e0   : > { %v1613_v17 = vmax.f32 %v1595_v12, 0.0  ;;  %v1614_v53 = vmax.f32 %v1609_v14, 0.0 }
 0x5e2   : > { %v1615_v18 = vpack.c.bf16 %v1613_v17, %v1611_v15  ;;  %v1616_v19 = vpack.c.bf16 %v1614_v53, %v1612_v49 }
 0x5e4   : > { %1754 = vmatmul.bf16.vlgmr.msrb.gmra.mxu0 %v1615_v18  ;;  %1768 = vmatmul.bf16.vlgmr.msra.gmra.mxu1 %v1616_v19 }
 0x661   : > { %v1755_v21 = vpop.f32.mrf.mxu0  ;;  %v1769_v50 = vpop.f32.mrf.mxu1 }
 0x662   : > { %v1756_v22 = vadd.f32 %v1755_v21, %v1649_v20 }
 0x664   : > { %v1770_v23 = vadd.f32 %v1769_v50, %v1756_v22 }
 0x666   : > { %v1774_v24 = vadd.f32 %v1770_v23, %v1478_v54 }
 0x668   : > { %1776 = vadd.xlane.f32.xlu1 %v1774_v24  ;;  %v1782_v25 = vmul.f32 %v1774_v24, %v1774_v24 }
 0x669   : > { %v1757_v26 = vpop.f32.mrf.mxu0  ;;  %v1771_v28 = vpop.f32.mrf.mxu1 }
 0x66a   : > { %v1758_v27 = vadd.f32 %v1757_v26, %v1649_v20  ;;  %1784 = vadd.xlane.f32.xlu2 %v1782_v25 }
 0x66c   : > { %v1772_v29 = vadd.f32 %v1771_v28, %v1758_v27 }
 0x66e   : > { %v1775_v30 = vadd.f32 %v1772_v29, %v1479_v51 }
 0x670   : > { %1778 = vadd.xlane.f32.xlu0 %v1775_v30  ;;  %v1783_v31 = vmul.f32 %v1775_v30, %v1775_v30 }
 0x672   : > { %1786 = vadd.xlane.f32.xlu1 %v1783_v31 }
 0x6db   : > { %v1777_v32 = vpop.xlane.xlu1 %1776 }
 0x6dc   : > { %v1780_v33 = vmul.f32 %v1777_v32, %v3189_v57 }
 0x6dd   : > { %v1785_v34 = vpop.xlane.xlu2 %1784 }
 0x6de   : > { %v1792_v35 = vmul.f32 %v1780_v33, %v1780_v33  ;;  %v1788_v36 = vmul.f32 %v1785_v34, %v3189_v57  ;;  %v1790_v51 = vsub.f32 %v1774_v24, %v1780_v33 }
 0x6e0   : > { %v1794_v37 = vsub.f32 %v1788_v36, %v1792_v35 }
 0x6e2   : > { %v1796_v38 = vadd.f32 1e-05, %v1794_v37 }
 0x6e3   : > { %v1779_v39 = vpop.xlane.xlu0 %1778 }
 0x6e4   : > { %2530 = vrsqrt.f32 %v1796_v38  ;;  %v1781_v40 = vmul.f32 %v1779_v39, %v3189_v57  ;;  %vm1804_vm13 = vweird.f32 %v1796_v38 }
 0x6e5   : > { %v1787_v41 = vpop.xlane.xlu1 %1786 }
 0x6e6   : > { %v1793_v42 = vmul.f32 %v1781_v40, %v1781_v40  ;;  %v1789_v43 = vmul.f32 %v1787_v41, %v3189_v57  ;;  %v1791_v4 = vsub.f32 %v1775_v30, %v1781_v40 }
 0x6e8   : > { %v1795_v44 = vsub.f32 %v1789_v43, %v1793_v42 }
 0x6ea   : > { %v2531_v45 = vpop.eup %2530  ;;  %v1797_v46 = vadd.f32 1e-05, %v1795_v44 }
 0x6eb   : > { %v1799_v47 = vmul.f32 %v2531_v45, %v1796_v38  ;;  %vm1805_vm12 = vweird.f32 %v2531_v45 }
 0x6ec   : > { %2532 = vrsqrt.f32 %v1797_v46  ;;  %vm1806_vm14 = vmor %vm1804_vm13, %vm1805_vm12  ;;  %vm1814_vm0 = vweird.f32 %v1797_v46 }
 0x6ed   : > { %v1800_v48 = vmul.f32 %v2531_v45, %v1799_v47 }
 0x6ef   : > { %v1801_v13 = vmul.f32 0.5, %v1800_v48 }
 0x6f1   : > { %v1802_v52 = vsub.f32 1.5, %v1801_v13 }
 0x6f2   : > { %v2533_v11 = vpop.eup %2532 }
 0x6f3   : > { %v1803_v55 = vmul.f32 %v2531_v45, %v1802_v52  ;;  %v1809_v54 = vmul.f32 %v2533_v11, %v1797_v46  ;;  %vm1815_vm15 = vweird.f32 %v2533_v11 }
 0x6f4   : > { %vm1816_vm1 = vmor %vm1814_vm0, %vm1815_vm15 }
 0x6f5   : > { %v1807_v59 = vsel %vm1806_vm14, %v2531_v45, %v1803_v55  ;;  %v1810_v16 = vmul.f32 %v2533_v11, %v1809_v54 }
 0x6f6   : > { %v1818_v57 = vmul.f32 %v1807_v59, %v1790_v51 }
 0x6f7   : > { %v1811_v61 = vmul.f32 0.5, %v1810_v16 }
 0x6f8   : > { %v1821_v62 = vmul.f32 %v1820_v58, %v1818_v57 }
 0x6f9   : > { %v1812_v1 = vsub.f32 1.5, %v1811_v61 }
 0x6fa   : > { %v1824_v2 = vadd.f32 %v1823_v60, %v1821_v62 }
 0x6fb   : > { %v1813_v3 = vmul.f32 %v2533_v11, %v1812_v1 }
 0x6fc   : > { %1826 = vst [vmem:[#allocation10] sm:$0xff] %v1824_v2 }
 0x6fd   : > { %v1817_v5 = vsel %vm1816_vm1, %v2533_v11, %v1813_v3 }
 0x6fe   : > { %v1819_v6 = vmul.f32 %v1817_v5, %v1791_v4 }
 0x700   : > { %v1822_v8 = vmul.f32 %v1820_v58, %v1819_v6 }
 0x702   : > { %v1825_v0 = vadd.f32 %v1823_v60, %v1822_v8 }
 0x704   : > { %1827 = vst [vmem:[#allocation10 + $0x8] sm:$0xff] %v1825_v0 }
 0x705   : > { %2410 = dma.vmem_to_hbm [thread:$0]  (%p2427_p1), %s1837_s25, 256, %s1839_s18, [#allocation4], %s2757_s27, %s2757_s27, %s2758_s19  }
 0x706   : > { %2719 = dma.done.wait (%p2427_p1), [#allocation4], 256  }
 0x707   : > { %2721 = vsyncadd (%p2427_p1), [#allocation4], 4294967040 }
 0x708 PF: > { %s3296_s0 = sld [smem:[#allocation16_spill]]  ;;  %s3300_s30 = smov %s2728_s10 }
 0x709   : > { %s3297_s21 = sld [smem:[#allocation15_spill]]  ;;  %s3302_s12 = smov %s2740_s13 }
 0x70a   : > { %s3298_s11 = sld [smem:[#allocation18_spill]] }
 0x70b   : > { %s3299_s24 = sld [smem:[#allocation17_spill]] }
 0x70e   : > { %s29_s14 = sadd.s32 1, %s3296_s0  }
 0x70f   : > { %p26_p2 = scmp.ge.s32.totalorder %s29_s14, 4   ;;  %s3301_s10 = smov %s3297_s21 }
 0x711   : > { %s3303_s13 = smov %s3299_s24  ;;  %28 = sbr.rel (!%p26_p2) target bundleno = 15 (0xf), region = 150 }
 0x716   :  { %1855 = vsyncpa [#allocation3], 1 }
 0x717   :  { %1857 = vsyncpa [#allocation3 + $0x1], 1 }
 0x718   :  { %1858 = vsyncpa [#allocation6], 1 }
 0x719   :  { %1860 = vsyncpa [#allocation6 + $0x1], 1 }
 0x71a   :  { %1861 = vsyncpa [#allocation9], 1 }
 0x71b   :  { %1863 = vsyncpa [#allocation9 + $0x1], 1 }
 0x71c   :  { %1864 = vsyncpa [#allocation4], 1 }
 0x71d   :  { %1866 = vsyncpa [#allocation4 + $0x1], 1 }

</bundles_post_ra>
